<compile_context>
chip_gen: v6e
topology: v6e:2x2x1
jax: 0.10.0
libtpu: 0.0.40
codegen_flags: <defaults>
</compile_context>

<pallas_src>
import jax
import jax.numpy as jnp
from jax.experimental import pallas as pl
from jax.experimental.pallas import tpu as pltpu


def ffn_kernel(x_ref, w12_ref, w3_ref, o_ref, acc_ref):
    """One (row-tile, hidden-tile) grid step of the SwiGLU FFN.

    x_ref:   (tm, E)       input rows (resident across the H axis)
    w12_ref: (E, 2*tH)     [W1_tile | W2_tile] fused gate/up weight tile
    w3_ref:  (tH, E)       down-projection weight tile
    o_ref:   (tm, E)       output rows (written on the last H step)
    acc_ref: (tm, E) f32   fc3 accumulator (VMEM scratch)
    """
    h = pl.program_id(1)

    @pl.when(h == 0)
    def _():
        acc_ref[...] = jnp.zeros_like(acc_ref)

    th = w3_ref.shape[0]
    x = x_ref[...]

    # Fused fc1 / fc2: one wide MXU matmul, then split the halves.
    h12 = jnp.dot(x, w12_ref[...], preferred_element_type=jnp.float32)
    h1 = h12[:, :th]
    h2 = h12[:, th:]
    act = (h1 * jax.nn.sigmoid(h1)) * h2          # SiLU(fc1) * fc2

    # fc3 partial product, accumulated over H tiles.
    acc_ref[...] += jnp.dot(act.astype(w3_ref.dtype), w3_ref[...],
                            preferred_element_type=jnp.float32)

    @pl.when(h == pl.num_programs(1) - 1)
    def _():
        o_ref[...] = acc_ref[...].astype(o_ref.dtype)


def feed_forward(x, w1, w2, w3, *, tm=256, th=512,
                 vmem_cap_bytes=64 * 1024 * 1024):
    """SwiGLU FFN. x: (B, T, E); w1, w2: (E, H); w3: (H, E) -> (B, T, E)."""
    B, T, E = x.shape
    Ew, H = w1.shape
    assert Ew == E and w2.shape == (E, H) and w3.shape == (H, E)
    M = B * T

    # --- tile sizing --------------------------------------------------------
    if M <= tm:
        tm = M          # a full-extent block is always a legal block shape
    # else: tm stays 128/256 (multiple of 8/16/32 -> legal for f32/bf16/int8)
    # and the ragged tail is handled by pl.cdiv + Pallas edge-block clipping.

    if H % th != 0 or (th < H and ((2 * th) % 128 != 0 or th % 8 != 0)):
        # Awkward shapes: fall back to the full hidden dim. Real configs
        # should pick th as a 128-multiple divisor of H (e.g. 512/1024/2048).
        th = H
    n_h = H // th

    # --- fuse W1 || W2 per hidden tile --------------------------------------
    # Interleave so that H-tile h of the fused weight holds
    # [W1[:, h*th:(h+1)*th] | W2[:, h*th:(h+1)*th]] along the lane dim.
    w12 = jnp.concatenate(
        [w1.reshape(E, n_h, th), w2.reshape(E, n_h, th)], axis=2
    ).reshape(E, 2 * H)

    x2d = x.reshape(M, E)

    # --- VMEM budget (explicit, capped for v7x's 64 MiB) --------------------
    xdt = jnp.dtype(x.dtype).itemsize
    wdt = jnp.dtype(w1.dtype).itemsize
    est = (
        2 * tm * E * xdt             # x tile, double-buffered
        + 2 * E * (2 * th) * wdt     # fused W1||W2 tile, double-buffered
        + 2 * th * E * wdt           # W3 tile, double-buffered
        + 2 * tm * E * xdt           # output tile, double-buffered
        + tm * E * 4                 # f32 accumulator scratch
        + 3 * tm * (2 * th) * 4      # h12 / act f32 temporaries + headroom
    )
    vmem_limit = int(min(max(2 * est, 32 * 1024 * 1024), vmem_cap_bytes))

    grid = (pl.cdiv(M, tm), n_h)

    out2d = pl.pallas_call(
        ffn_kernel,
        out_shape=jax.ShapeDtypeStruct((M, E), x.dtype),
        grid_spec=pltpu.PrefetchScalarGridSpec(
            num_scalar_prefetch=0,
            grid=grid,
            in_specs=[
                pl.BlockSpec((tm, E), lambda i, h: (i, 0)),       # x rows
                pl.BlockSpec((E, 2 * th), lambda i, h: (0, h)),   # W1||W2 tile
                pl.BlockSpec((th, E), lambda i, h: (h, 0)),       # W3 tile
            ],
            out_specs=pl.BlockSpec((tm, E), lambda i, h: (i, 0)),
            scratch_shapes=[pltpu.VMEM((tm, E), jnp.float32)],
        ),
        compiler_params=pltpu.CompilerParams(
            # M rows are independent ('parallel' -> 2-TC sharding on v7x);
            # H is the fc3 reduction axis ('arbitrary', last).
            dimension_semantics=("parallel", "arbitrary"),
            vmem_limit_bytes=vmem_limit,
        ),
    )(x2d, w12, w3)

    return out2d.reshape(B, T, E)


def feed_forward_ref(x, w1, w2, w3):
    """Pure-JAX reference matching the PyTorch module semantics."""
    h1 = jnp.einsum("bte,eh->bth", x.astype(jnp.float32), w1.astype(jnp.float32))
    h2 = jnp.einsum("bte,eh->bth", x.astype(jnp.float32), w2.astype(jnp.float32))
    act = jax.nn.silu(h1) * h2
    out = jnp.einsum("bth,he->bte", act, w3.astype(jnp.float32))
    return out.astype(x.dtype)


if __name__ == "__main__":
    # Small config: emb_dim=256, hidden_dim=512, batch=2, seq=72 (ragged
    # M=144 exercises the cdiv tail; th=256 exercises the H accumulator).
    B, T, E, H = 2, 72, 256, 512
    dtype = jnp.float32

    key = jax.random.PRNGKey(0)
    kx, k1, k2, k3 = jax.random.split(key, 4)
    x = jax.random.normal(kx, (B, T, E), dtype=dtype)
    # "Linear" weights stored as (in, out) == nn.Linear.weight.T.
    w1 = (jax.random.normal(k1, (E, H), dtype=jnp.float32) * (E ** -0.5)).astype(dtype)
    w2 = (jax.random.normal(k2, (E, H), dtype=jnp.float32) * (E ** -0.5)).astype(dtype)
    w3 = (jax.random.normal(k3, (H, E), dtype=jnp.float32) * (H ** -0.5)).astype(dtype)

    out = feed_forward(x, w1, w2, w3, tm=128, th=256)
    out = jax.block_until_ready(out)

    ref = feed_forward_ref(x, w1, w2, w3)
    assert out.shape == (B, T, E), out.shape
    err = float(jnp.max(jnp.abs(out.astype(jnp.float32) - ref.astype(jnp.float32))))
    assert jnp.allclose(out, ref, atol=1e-3, rtol=1e-3), f"mismatch vs reference, max abs err={err}"

    print("KERNEL_OK")
</pallas_src>

<mosaic_0001>
module attributes {stable_mosaic.version = 11 : i64} {
  func.func @ffn_kernel(%arg0: i32, %arg1: i32, %arg2: memref<128x256xf32, #tpu.memory_space<vmem>>, %arg3: memref<256x512xf32, #tpu.memory_space<vmem>>, %arg4: memref<256x256xf32, #tpu.memory_space<vmem>>, %arg5: memref<128x256xf32, #tpu.memory_space<vmem>>, %arg6: memref<128x256xf32, #tpu.memory_space<vmem>>) attributes {dimension_semantics = [#tpu.dimension_semantics<parallel>, #tpu.dimension_semantics<arbitrary>], iteration_bounds = array<i64: 2, 2>, scalar_prefetch = 0 : i64, scratch_operands = 1 : i64, tpu.core_type = #tpu.core_type<tc>, window_params = [{transform_indices = @transform_0, window_bounds = array<i64: 128, 256>}, {transform_indices = @transform_1, window_bounds = array<i64: 256, 512>}, {transform_indices = @transform_2, window_bounds = array<i64: 256, 256>}, {transform_indices = @transform_3, window_bounds = array<i64: 128, 256>}]} {
    %c0_i32 = arith.constant 0 : i32
    %0 = arith.cmpi eq, %arg1, %c0_i32 : i32
    %1 = arith.extui %0 : i1 to i32
    %c0_i32_0 = arith.constant 0 : i32
    %2 = arith.cmpi ne, %1, %c0_i32_0 : i32
    scf.if %2 {
      %cst_13 = arith.constant 0.000000e+00 : f32
      %23 = vector.broadcast %cst_13 : f32 to vector<128x256xf32>
      %c0_14 = arith.constant 0 : index
      %c0_15 = arith.constant 0 : index
      %24 = vector.load %arg6[%c0_14, %c0_15] : memref<128x256xf32, #tpu.memory_space<vmem>>, vector<128x256xf32>
      tpu.vector_store %arg6[%c0_14, %c0_15], %23 {strides = array<i32>} : memref<128x256xf32, #tpu.memory_space<vmem>>, vector<128x256xf32>,
    } else {
    }
    %c0 = arith.constant 0 : index
    %c0_1 = arith.constant 0 : index
    %3 = vector.load %arg2[%c0, %c0_1] : memref<128x256xf32, #tpu.memory_space<vmem>>, vector<128x256xf32>
    %c0_2 = arith.constant 0 : index
    %c0_3 = arith.constant 0 : index
    %4 = vector.load %arg3[%c0_2, %c0_3] : memref<256x512xf32, #tpu.memory_space<vmem>>, vector<256x512xf32>
    %cst = arith.constant dense<0.000000e+00> : vector<128x512xf32>
    %5 = tpu.matmul %3, %4, %cst {dimension_numbers = #tpu.dot_dimension_numbers<[1], [0], [0], [1], [0, 0, 1, 1], [], []>} : vector<128x256xf32>, vector<256x512xf32>, vector<128x512xf32> -> vector<128x512xf32>
    %6 = vector.extract_strided_slice %5 {offsets = [0, 0], sizes = [128, 256], strides = [1, 1]} : vector<128x512xf32> to vector<128x256xf32>
    %7 = vector.extract_strided_slice %5 {offsets = [0, 256], sizes = [128, 256], strides = [1, 1]} : vector<128x512xf32> to vector<128x256xf32>
    %8 = arith.negf %6 : vector<128x256xf32>
    %9 = math.exp %8 : vector<128x256xf32>
    %cst_4 = arith.constant 1.000000e+00 : f32
    %10 = vector.broadcast %cst_4 : f32 to vector<128x256xf32>
    %11 = arith.addf %10, %9 : vector<128x256xf32>
    %12 = arith.divf %10, %11 : vector<128x256xf32>
    %13 = arith.mulf %6, %12 : vector<128x256xf32>
    %14 = arith.mulf %13, %7 : vector<128x256xf32>
    %c0_5 = arith.constant 0 : index
    %c0_6 = arith.constant 0 : index
    %15 = vector.load %arg6[%c0_5, %c0_6] : memref<128x256xf32, #tpu.memory_space<vmem>>, vector<128x256xf32>
    %c0_7 = arith.constant 0 : index
    %c0_8 = arith.constant 0 : index
    %16 = vector.load %arg4[%c0_7, %c0_8] : memref<256x256xf32, #tpu.memory_space<vmem>>, vector<256x256xf32>
    %cst_9 = arith.constant dense<0.000000e+00> : vector<128x256xf32>
    %17 = tpu.matmul %14, %16, %cst_9 {dimension_numbers = #tpu.dot_dimension_numbers<[1], [0], [0], [1], [0, 0, 1, 1], [], []>} : vector<128x256xf32>, vector<256x256xf32>, vector<128x256xf32> -> vector<128x256xf32>
    %18 = arith.addf %15, %17 : vector<128x256xf32>
    %c0_10 = arith.constant 0 : index
    %c0_11 = arith.constant 0 : index
    %19 = vector.load %arg6[%c0_10, %c0_11] : memref<128x256xf32, #tpu.memory_space<vmem>>, vector<128x256xf32>
    tpu.vector_store %arg6[%c0_10, %c0_11], %18 {strides = array<i32>} : memref<128x256xf32, #tpu.memory_space<vmem>>, vector<128x256xf32>,
    %c1_i32 = arith.constant 1 : i32
    %20 = arith.cmpi eq, %arg1, %c1_i32 : i32
    %21 = arith.extui %20 : i1 to i32
    %c0_i32_12 = arith.constant 0 : i32
    %22 = arith.cmpi ne, %21, %c0_i32_12 : i32
    scf.if %22 {
      %c0_13 = arith.constant 0 : index
      %c0_14 = arith.constant 0 : index
      %23 = vector.load %arg6[%c0_13, %c0_14] : memref<128x256xf32, #tpu.memory_space<vmem>>, vector<128x256xf32>
      %c0_15 = arith.constant 0 : index
      %c0_16 = arith.constant 0 : index
      %24 = vector.load %arg5[%c0_15, %c0_16] : memref<128x256xf32, #tpu.memory_space<vmem>>, vector<128x256xf32>
      tpu.vector_store %arg5[%c0_15, %c0_16], %23 {strides = array<i32>} : memref<128x256xf32, #tpu.memory_space<vmem>>, vector<128x256xf32>,
    } else {
    }
    return
  }
  func.func @transform_0(%arg0: i32, %arg1: i32) -> (i32, i32) {
    %c0_i32 = arith.constant 0 : i32
    %c0_i32_0 = arith.constant 0 : i32
    return %arg0, %c0_i32 : i32, i32
  }
  func.func @transform_1(%arg0: i32, %arg1: i32) -> (i32, i32) {
    %c0_i32 = arith.constant 0 : i32
    %c0_i32_0 = arith.constant 0 : i32
    return %c0_i32, %arg1 : i32, i32
  }
  func.func @transform_2(%arg0: i32, %arg1: i32) -> (i32, i32) {
    %c0_i32 = arith.constant 0 : i32
    %c0_i32_0 = arith.constant 0 : i32
    return %arg1, %c0_i32 : i32, i32
  }
  func.func @transform_3(%arg0: i32, %arg1: i32) -> (i32, i32) {
    %c0_i32 = arith.constant 0 : i32
    %c0_i32_0 = arith.constant 0 : i32
    return %arg0, %c0_i32 : i32, i32
  }
}

</mosaic_0001>

<bundles_post_ra>
// kernel: tpu_custom_call.1
= control target key start
LH: loop header
LB: loop body
LE: loop exit
PB: predicated region body
PF: predicated region fallthrough
CT: control target
= control target key end

     0   :  { %s2995_s0 = inlined_call_operand.hbm [shape: f32[144,256], index: 0, kind: input, shape index: {}]   ;;  %s2996_s1 = inlined_call_operand.hbm [shape: f32[256,1024], index: 1, kind: input, shape index: {}]   ;;  %s2997_s2 = inlined_call_operand.hbm [shape: f32[512,256], index: 2, kind: input, shape index: {}]   ;;  %s2998_s3 = inlined_call_operand.hbm [shape: f32[144,256], index: 3, kind: output, shape index: {}]  }
   0x1   :  { %3007 = sst [smem:[#allocation21_spill]] %s2995_s0 }
   0x2   :  { %3008 = sst [smem:[#allocation22_spill]] %s2996_s1 }
   0x3   :  { %3009 = sst [smem:[#allocation23_spill]] %s2998_s3 }
   0x4   :  { %8 = vsyncpa [#allocation4], 0 }
   0x5   :  { %10 = vsyncpa [#allocation4 + $0x1], 0 }
   0x6   :  { %11 = vsyncpa [#allocation7], 0 }
   0x7   :  { %13 = vsyncpa [#allocation7 + $0x1], 0 }
   0x8   :  { %14 = vsyncpa [#allocation5], 0 }
   0x9   :  { %16 = vsyncpa [#allocation5 + $0x1], 0  ;;  %s2231_s12 = smov 0   ;;  %s2233_s13 = smov 0  }
   0xa   :  { %s2235_s14 = smov 0   ;;  %s2237_s15 = smov 0  }
   0xb   :  { %s2239_s16 = smov 0   ;;  %s2241_s17 = smov 0  }
   0xc   :  { %s2243_s18 = smov 0   ;;  %s2245_s19 = smov 0  }
   0xd   :  { %s2247_s20 = smov 0   ;;  %s2249_s21 = smov 0  }
   0xe   :  { %s2251_s22 = smov 0  }
   0xf LB: > { %3010 = sst [smem:[#allocation13_spill]] %s2167_s15  ;;  %s2287_s23 = sadd.s32 4294967295, %s2195_s22   ;;  %s2195_s22 = sphi %s2251_s22, %s22_s22   ;;  %s2191_s21 = sphi %s2249_s21, %s3037_s21   ;;  %s2187_s20 = sphi %s2247_s20, %s3044_s20   ;;  %s2183_s19 = sphi %s2245_s19, %s3035_s19   ;;  %s2179_s18 = sphi %s2243_s18, %s3043_s18   ;;  %s2175_s17 = sphi %s2241_s17, %s3034_s17   ;;  %s2171_s16 = sphi %s2239_s16, %s3042_s16   ;;  %s2167_s15 = sphi %s2237_s15, %s3041_s15   ;;  %s2163_s14 = sphi %s2235_s14, %s3040_s14   ;;  %s2159_s13 = sphi %s2233_s13, %s3039_s13   ;;  %s2155_s12 = sphi %s2231_s12, %s3038_s12  }
  0x10   : > { %3011 = sst [smem:[#allocation14_spill]] %s2175_s17  ;;  %s1614_s24 = sadd.s32 4294967294, %s2195_s22  }
  0x11   : > { %3012 = sst [smem:[#allocation15_spill]] %s2191_s21  ;;  %s31_s25 = sadd.s32 1, %s2187_s20 }
  0x12   : > { %s34_s26 = sadd.s32 1, %s2191_s21  ;;  %p32_p0 = scmp.ge.s32.totalorder %s31_s25, 2 }
  0x13   : > { %s41_s27 = sadd.s32 1, %s2175_s17  ;;  %p48_p1 = scmp.ne.s32.totalorder %s2175_s17, %s2171_s16 }
  0x14   : > { %p49_p2 = scmp.eq.s32.totalorder %s2195_s22, 0  ;;  %s3046_s25 = smov (%p32_p0, %s31_s25), 0 }
  0x15   : > { %3013 = sst [smem:[#allocation16_spill]] %s3046_s25  ;;  %s3048_s26 = smov (!%p32_p0, %s34_s26), %s2191_s21 }
  0x16   : > { %p2304_p3 = por %p49_p2, %p48_p1  ;;  %p2999_p4 = scmp.ne.s32.totalorder %s2171_s16, %s2167_s15 }
  0x17   : > { %p36_p5 = scmp.ge.s32.totalorder %s3048_s26, 2  ;;  %p55_p6 = scmp.eq.s32.totalorder %s2287_s23, 0 }
  0x18   : > { %s64_s29 = ssub.s32 %s2187_s20, %s3046_s25  ;;  %s67_s30 = sadd.s32 1, %s2163_s14 }
  0x19   : > { %s3050_s26 = smov (%p36_p5, %s3048_s26), 0  ;;  %p2321_p7 = por %p55_p6, %p2999_p4 }
  0x1a   : > { %3015 = sst [smem:[#allocation17_spill]] %s3050_s26  ;;  %p65_p8 = scmp.eq.s32.totalorder %s64_s29, 0 }
  0x1b   : > { %s38_s5 = ssub.s32 %s2191_s21, %s3050_s26  ;;  %p74_p9 = scmp.ne.s32.totalorder %s2163_s14, %s2159_s13 }
  0x1c   : > { %p39_p10 = scmp.eq.s32.totalorder %s38_s5, 0  ;;  %p80_p11 = scmp.ne.s32.totalorder %s2159_s13, %s2155_s12 }
  0x1d   : > { %s2332_s6 = scalar_select %p65_p8, %s2163_s14, %s67_s30  }
  0x1e   : > { %s2335_s7 = scalar_select %p39_p10, %s2175_s17, %s41_s27  }
  0x1f   : > { %3017 = sst [smem:[#allocation18_spill]] %s2332_s6  ;;  %p2339_p12 = por %p74_p9, %p49_p2 }
  0x20   : > { %3018 = sst [smem:[#allocation19_spill]] %s2335_s7  ;;  %p2345_p13 = por %p80_p11, %p55_p6 }
  0x21   : > { %p130_p0 = scmp.eq.s32.totalorder %s2287_s23, 3  ;;  %p136_p5 = scmp.eq.s32.totalorder %s1614_s24, 3 }
  0x22   : > { %p3022_p8 = scmp.ne.s32.totalorder %s2171_s16, %s2167_s15  ;;  %p1616_p2 = scmp.ge.s32.totalorder %s2195_s22, 4 }
  0x23   : > { %p2353_p4 = por %p130_p0, %p48_p1 }
  0x24   : > { %p2360_p10 = por %p136_p5, %p3022_p8  ;;  %152 = sbr.rel (%p1616_p2) target bundleno = 110 (0x6e), region = 16 }
  0x25   : > { %s3021_s10 = scalar_select %p2353_p4, 1, 0 }
  0x26   : > { %s3023_s11 = scalar_select %p2360_p10, 1, 0 }
  0x28   : > { %3024 = sst [smem:[#allocation20_spill]] %s3023_s11 }
  0x29   : > { %155 = sbr.rel (!%p2304_p3) target bundleno = 79 (0x4f), region = 20  ;;  %s156_s12 = sand.u32 (%p2304_p3), 1, %s2175_s17  }
  0x2a   : > { %s1618_s24 = sshll.u32 (%p2304_p3), %s2191_s21, 4  ;;  %s1617_s27 = sshll.u32 (%p2304_p3), %s156_s12, 8 }
  0x2b   : > { %s162_s29 = ssub.s32 (%p2304_p3), 18, %s1618_s24  ;;  %s2372_s26 = scalar_lea.sflag (%p2304_p3), [#allocation4], %s156_s12 }
  0x2c   : > { %p163_p1 = scmp.lt.s32.totalorder (%p2304_p3), %s162_s29, 16  ;;  %s160_s25 = scalar_lea.vmem (%p2304_p3), [#allocation3], %s1617_s27 }
  0x2e   : > { %s3052_s29 = smov (!%p163_p1, %s162_s29), 16 }
  0x2f   : > { %s2369_s30 = sshll.u32 %s3052_s29, 8 }
  0x30   : > { %s168_s5 = ssub.s32 4096, %s2369_s30 }
  0x31   : > { %169 = vsyncadd %s2372_s26, %s168_s5  ;;  %p1621_p3 = scmp.ne.s32.totalorder %s2369_s30, 0  ;;  %s1685_s28 = sshll.u32 %s2191_s21, 12 }
  0x32   : > { %s3025_s0 = sld [smem:[#allocation21_spill]]  ;;  %s175_s29 = sshll.u32 %s160_s25, 4  ;;  %s2382_s29 = int_to_ptr.vmem [resolvable:$true] %s175_s29 }
  0x38   : > { %s2380_s24 = scalar_lea.hbm %s3025_s0, %s1685_s28  ;;  %s1997_s6 = scalar_lea.hbm %s3025_s0, 4608 }
  0x39   : > { %s1993_s12 = scalar_lea.hbm %s2380_s24, %s2369_s30 }
  0x3a   : > { %p1994_p6 = scmp.ne.s32.totalorder %s2380_s24, %s1993_s12  ;;  %p1999_p0 = scmp.lt.s32.totalorder %s1997_s6, %s1993_s12 }
  0x3c   : > { %p1995_p9 = pnand %p1994_p6, %p1621_p3 }
  0x3e   : > { %p1996_p11 = pneg %p1995_p9 }
  0x40   : > { %p2001_p5 = pnand %p1999_p0, %p1996_p11 }
  0x42   : > { %2004 = shalt.err (!%p2001_p5)
}
  0x43   : > { %s2005_s17 = scalar_lea.vmem %s2382_s29, %s2369_s30  ;;  %s2197_s25 = smov [#allocation3]  }
  0x44   : > { %p2006_p8 = scmp.ne.s32.totalorder %s2382_s29, %s2005_s17  ;;  %s2009_s7 = sshll.u32 %s2197_s25, 4  ;;  %s2010_s7 = int_to_ptr.vmem [resolvable:$false] %s2009_s7 }
  0x45   : > { %s2011_s28 = scalar_lea.vmem %s2010_s7, 8192  ;;  %p2012_p6 = scmp.lt.s32.totalorder %s2382_s29, %s2010_s7 }
  0x46   : > { %p2007_p2 = pnand %p2006_p8, %p1621_p3  ;;  %p2013_p9 = scmp.lt.s32.totalorder %s2011_s28, %s2005_s17 }
  0x48   : > { %p2008_p1 = pneg %p2007_p2  ;;  %p2014_p10 = por %p2013_p9, %p2012_p6 }
  0x4a   : > { %p2015_p4 = pnand %p2014_p10, %p2008_p1 }
  0x4c   : > { %2018 = shalt.err (!%p2015_p4)
}
  0x4d   : > { %s2198_s6 = smov 256   ;;  %s2199_s12 = smov 16  }
  0x4e   : > { %181 = dma.hbm_to_vmem [thread:$0]  (%p1621_p3), %s2380_s24, %s2369_s30, %s2382_s29, %s2372_s26, %s2198_s6, %s2198_s6, %s2199_s12  }
  0x4f PF: > { %s185_s27 = sand.u32 1, %s2195_s22   ;;  %s187_s5 = sand.u32 1, %s2163_s14  }
  0x50   : > { %s1626_s17 = sshll.u32 %s187_s5, 10  ;;  %s1686_s25 = sshll.u32 %s2187_s20, 9 }
  0x51   : > { %s3026_s1 = sld [smem:[#allocation22_spill]]  ;;  %s189_s21 = scalar_lea.vmem [#allocation6], %s1626_s17 }
  0x52   : > { %s196_s11 = sshll.u32 %s189_s21, 4  ;;  %s2412_s15 = scalar_lea.sflag [#allocation7], %s185_s27  ;;  %s197_s11 = int_to_ptr.vmem [resolvable:$true] %s196_s11 }
  0x53   : > { %s2031_s26 = scalar_lea.vmem %s197_s11, 16384  ;;  %s2200_s30 = smov [#allocation6]  }
  0x54   : > { %p2032_p4 = scmp.ne.s32.totalorder %s197_s11, %s2031_s26  ;;  %s2035_s24 = sshll.u32 %s2200_s30, 4  ;;  %s2036_s24 = int_to_ptr.vmem [resolvable:$false] %s2035_s24 }
  0x55   : > { %s2037_s29 = scalar_lea.vmem %s2036_s24, 32768  ;;  %p2038_p11 = scmp.lt.s32.totalorder %s197_s11, %s2036_s24 }
  0x56   : > { %p2033_p10 = pnand %p2032_p4, %p2339_p12  ;;  %p2039_p0 = scmp.lt.s32.totalorder %s2037_s29, %s2031_s26 }
  0x57   : > { %s195_s0 = scalar_lea.hbm %s3026_s1, %s1686_s25 }
  0x58   : > { %p2034_p3 = pneg %p2033_p10  ;;  %p2040_p5 = por %p2039_p0, %p2038_p11 }
  0x5a   : > { %p2041_p8 = pnand %p2040_p5, %p2034_p3 }
  0x5c   : > { %2044 = shalt.err (!%p2041_p8)
}
  0x5d   : > { %s2201_s6 = smov 1024   ;;  %s2202_s21 = smov 512  }
  0x5e   : > { %s2203_s12 = smov 32   ;;  %s1629_s27 = sshll.u32 %s187_s5, 9 }
  0x5f   : > { %1756 = dma.hbm_to_vmem [thread:$0]  (%p2339_p12), %s195_s0, 16384, %s197_s11, %s2412_s15, %s2201_s6, %s2202_s21, %s2203_s12  }
  0x60   : > { %s1688_s17 = sshll.u32 %s2187_s20, 13  ;;  %s210_s26 = scalar_lea.vmem [#allocation8], %s1629_s27 }
  0x61   : > { %s217_s28 = scalar_lea.hbm %s2997_s2, %s1688_s17  ;;  %s218_s30 = sshll.u32 %s210_s26, 4  ;;  %s219_s30 = int_to_ptr.vmem [resolvable:$true] %s218_s30 }
  0x62   : > { %s2057_s24 = scalar_lea.vmem %s219_s30, 8192  ;;  %s2204_s29 = smov [#allocation8]  }
  0x63   : > { %p2058_p2 = scmp.ne.s32.totalorder %s219_s30, %s2057_s24  ;;  %s2061_s1 = sshll.u32 %s2204_s29, 4  ;;  %s2062_s1 = int_to_ptr.vmem [resolvable:$false] %s2061_s1 }
  0x64   : > { %s2063_s3 = scalar_lea.vmem %s2062_s1, 16384  ;;  %p2064_p9 = scmp.lt.s32.totalorder %s219_s30, %s2062_s1 }
  0x65   : > { %p2059_p1 = pnand %p2058_p2, %p2339_p12  ;;  %p2065_p4 = scmp.lt.s32.totalorder %s2063_s3, %s2057_s24 }
  0x67   : > { %p2060_p6 = pneg %p2059_p1  ;;  %p2066_p10 = por %p2065_p4, %p2064_p9 }
  0x69   : > { %p2067_p3 = pnand %p2066_p10, %p2060_p6 }
  0x6b   : > { %2070 = shalt.err (!%p2067_p3)
}
  0x6c   : > { %s2205_s0 = smov 256   ;;  %s2206_s11 = smov 16  }
  0x6d   : > { %1757 = dma.hbm_to_vmem [thread:$0]  (%p2339_p12), %s217_s28, 8192, %s219_s30, %s2412_s15, %s2205_s0, %s2205_s0, %s2206_s11  }
  0x6e PF: > { %p1633_p11 = scmp.ge.s32.totalorder %s2195_s22, 1  ;;  %p226_p0 = scmp.lt.s32.totalorder %s2195_s22, 5 }
  0x70   : > { %p227_p5 = pnand %p1633_p11, %p226_p0 }
  0x71   : > { %s2433_s1 = sand.u32 (!%p227_p5), 1, %s2171_s16  }
  0x72   : > { %230 = sbr.rel (%p227_p5) target bundleno = 757 (0x2f5), region = 32  ;;  %s1634_s3 = sshll.u32 (!%p227_p5), %s2433_s1, 8 }
  0x73   : > { %s233_s5 = scalar_lea.sflag (!%p227_p5), [#allocation4], %s2433_s1  ;;  %s2437_s6 = scalar_lea.vmem (!%p227_p5), [#allocation3], %s1634_s3 }
  0x77   : > { %2142 = dma.done.wait (%p2321_p7), %s233_s5, 4096  }
  0x78   : > { %2144 = vsyncadd (%p2321_p7), %s233_s5, 4294963200  ;;  %s241_s15 = sand.u32 1, %s2287_s23   ;;  %s243_s8 = sand.u32 1, %s2159_s13  }
  0x79   : > { %s1635_s21 = sshll.u32 %s243_s8, 10  ;;  %s242_s12 = scalar_lea.sflag [#allocation7], %s241_s15 }
  0x7a   : > { %s2445_s27 = scalar_lea.vmem [#allocation6], %s1635_s21 }
  0x7b   : > { %2146 = dma.done.wait (%p2345_p13), %s242_s12, 24576  }
  0x7c   : > { %2148 = vsyncadd (%p2345_p13), %s242_s12, 4294942720  ;;  %s1636_s17 = sshll.u32 %s243_s8, 9  ;;  %s2453_s7 = scalar_lea.vmem [#allocation9], %s1634_s3 }
  0x7d   : > { %s2451_s25 = scalar_lea.vmem [#allocation8], %s1636_s17  ;;  %p1638_p7 = scmp.ne.s32.totalorder %s2179_s18, 0 }
  0x7f   : > { %304 = sbr.rel (%p1638_p7) target bundleno = 149 (0x95), region = 48 }
  0x84   : > { %v2207_v0 = vmov 0.0  }
  0x85   : > { %305 = vst [vmem:[#allocation2 + $0xb0] sm:$0xff] %v2207_v0  ;;  %306 = vst [vmem:[#allocation2] sm:$0xff] %v2207_v0 }
  0x86   : > { %307 = vst [vmem:[#allocation2 + $0xd8] sm:$0xff] %v2207_v0  ;;  %308 = vst [vmem:[#allocation2 + $0x18] sm:$0xff] %v2207_v0 }
  0x87   : > { %309 = vst [vmem:[#allocation2 + $0x50] sm:$0xff] %v2207_v0  ;;  %310 = vst [vmem:[#allocation2 + $0x68] sm:$0xff] %v2207_v0 }
  0x88   : > { %311 = vst [vmem:[#allocation2 + $0x30] sm:$0xff] %v2207_v0  ;;  %312 = vst [vmem:[#allocation2 + $0x48] sm:$0xff] %v2207_v0 }
  0x89   : > { %313 = vst [vmem:[#allocation2 + $0x80] sm:$0xff] %v2207_v0  ;;  %314 = vst [vmem:[#allocation2 + $0x88] sm:$0xff] %v2207_v0 }
  0x8a   : > { %315 = vst [vmem:[#allocation2 + $0xe8] sm:$0xff] %v2207_v0  ;;  %316 = vst [vmem:[#allocation2 + $0xb8] sm:$0xff] %v2207_v0 }
  0x8b   : > { %317 = vst [vmem:[#allocation2 + $0x60] sm:$0xff] %v2207_v0  ;;  %318 = vst [vmem:[#allocation2 + $0xf0] sm:$0xff] %v2207_v0 }
  0x8c   : > { %319 = vst [vmem:[#allocation2 + $0x8] sm:$0xff] %v2207_v0  ;;  %320 = vst [vmem:[#allocation2 + $0x78] sm:$0xff] %v2207_v0 }
  0x8d   : > { %321 = vst [vmem:[#allocation2 + $0x38] sm:$0xff] %v2207_v0  ;;  %322 = vst [vmem:[#allocation2 + $0x58] sm:$0xff] %v2207_v0 }
  0x8e   : > { %323 = vst [vmem:[#allocation2 + $0x40] sm:$0xff] %v2207_v0  ;;  %324 = vst [vmem:[#allocation2 + $0xc8] sm:$0xff] %v2207_v0 }
  0x8f   : > { %325 = vst [vmem:[#allocation2 + $0xe0] sm:$0xff] %v2207_v0  ;;  %326 = vst [vmem:[#allocation2 + $0x90] sm:$0xff] %v2207_v0 }
  0x90   : > { %327 = vst [vmem:[#allocation2 + $0x70] sm:$0xff] %v2207_v0  ;;  %328 = vst [vmem:[#allocation2 + $0xc0] sm:$0xff] %v2207_v0 }
  0x91   : > { %329 = vst [vmem:[#allocation2 + $0xa8] sm:$0xff] %v2207_v0  ;;  %330 = vst [vmem:[#allocation2 + $0xd0] sm:$0xff] %v2207_v0 }
  0x92   : > { %331 = vst [vmem:[#allocation2 + $0x10] sm:$0xff] %v2207_v0  ;;  %332 = vst [vmem:[#allocation2 + $0x28] sm:$0xff] %v2207_v0 }
  0x93   : > { %333 = vst [vmem:[#allocation2 + $0xa0] sm:$0xff] %v2207_v0  ;;  %334 = vst [vmem:[#allocation2 + $0xf8] sm:$0xff] %v2207_v0 }
  0x94   : > { %335 = vst [vmem:[#allocation2 + $0x20] sm:$0xff] %v2207_v0  ;;  %336 = vst [vmem:[#allocation2 + $0x98] sm:$0xff] %v2207_v0 }
  0x95 PF: > { %v430_v1 = vld [vmem:[%s2445_s27 + $0x1e8] sm:$0xff]  ;;  %v429_v2 = vld [vmem:[%s2445_s27 + $0x1e0] sm:$0xff]  ;;  %v432_v15 = vld [vmem:[%s2445_s27 + $0x1f8] sm:$0xff]  ;;  %p1671_p12 = scmp.ne.s32.totalorder %s2179_s18, 1 }
  0x96   : > { %v426_v3 = vld [vmem:[%s2445_s27 + $0x1c8] sm:$0xff]  ;;  %497 = vmatprep.subr.mxu0 %v430_v1  ;;  %v425_v4 = vld [vmem:[%s2445_s27 + $0x1c0] sm:$0xff]  ;;  %v431_v16 = vld [vmem:[%s2445_s27 + $0x1f0] sm:$0xff]  ;;  %658 = vmatprep.subr.mxu1 %v432_v15 }
  0x97   : > { %498 = vmatpush1.msra.mxu0 %v429_v2  ;;  %v422_v5 = vld [vmem:[%s2445_s27 + $0x1a8] sm:$0xff]  ;;  %v421_v6 = vld [vmem:[%s2445_s27 + $0x1a0] sm:$0xff]  ;;  %v428_v18 = vld [vmem:[%s2445_s27 + $0x1d8] sm:$0xff]  ;;  %659 = vmatpush1.msra.mxu1 %v431_v16 }
  0x98   : > { %499 = vmatprep.subr.mxu0 %v426_v3  ;;  %v418_v7 = vld [vmem:[%s2445_s27 + $0x188] sm:$0xff]  ;;  %v417_v8 = vld [vmem:[%s2445_s27 + $0x180] sm:$0xff]  ;;  %v427_v20 = vld [vmem:[%s2445_s27 + $0x1d0] sm:$0xff]  ;;  %660 = vmatprep.subr.mxu1 %v428_v18 }
  0x99   : > { %500 = vmatpush1.msra.mxu0 %v425_v4  ;;  %v414_v9 = vld [vmem:[%s2445_s27 + $0x168] sm:$0xff]  ;;  %v413_v10 = vld [vmem:[%s2445_s27 + $0x160] sm:$0xff]  ;;  %v424_v21 = vld [vmem:[%s2445_s27 + $0x1b8] sm:$0xff]  ;;  %661 = vmatpush1.msra.mxu1 %v427_v20 }
  0x9a   : > { %501 = vmatprep.subr.mxu0 %v422_v5  ;;  %v410_v11 = vld [vmem:[%s2445_s27 + $0x148] sm:$0xff]  ;;  %v409_v12 = vld [vmem:[%s2445_s27 + $0x140] sm:$0xff]  ;;  %v423_v23 = vld [vmem:[%s2445_s27 + $0x1b0] sm:$0xff]  ;;  %662 = vmatprep.subr.mxu1 %v424_v21 }
  0x9b   : > { %502 = vmatpush1.msra.mxu0 %v421_v6  ;;  %v406_v13 = vld [vmem:[%s2445_s27 + $0x128] sm:$0xff]  ;;  %v405_v14 = vld [vmem:[%s2445_s27 + $0x120] sm:$0xff]  ;;  %v420_v25 = vld [vmem:[%s2445_s27 + $0x198] sm:$0xff]  ;;  %663 = vmatpush1.msra.mxu1 %v423_v23 }
  0x9c   : > { %503 = vmatprep.subr.mxu0 %v418_v7  ;;  %v402_v17 = vld [vmem:[%s2445_s27 + $0x108] sm:$0xff]  ;;  %v401_v19 = vld [vmem:[%s2445_s27 + $0x100] sm:$0xff]  ;;  %v419_v27 = vld [vmem:[%s2445_s27 + $0x190] sm:$0xff]  ;;  %664 = vmatprep.subr.mxu1 %v420_v25 }
  0x9d   : > { %504 = vmatpush1.msra.mxu0 %v417_v8  ;;  %v398_v22 = vld [vmem:[%s2445_s27 + $0xe8] sm:$0xff]  ;;  %v397_v24 = vld [vmem:[%s2445_s27 + $0xe0] sm:$0xff]  ;;  %v416_v29 = vld [vmem:[%s2445_s27 + $0x178] sm:$0xff]  ;;  %665 = vmatpush1.msra.mxu1 %v419_v27 }
  0x9e   : > { %505 = vmatprep.subr.mxu0 %v414_v9  ;;  %v394_v26 = vld [vmem:[%s2445_s27 + $0xc8] sm:$0xff]  ;;  %v393_v28 = vld [vmem:[%s2445_s27 + $0xc0] sm:$0xff]  ;;  %v415_v31 = vld [vmem:[%s2445_s27 + $0x170] sm:$0xff]  ;;  %666 = vmatprep.subr.mxu1 %v416_v29 }
  0x9f   : > { %506 = vmatpush1.msra.mxu0 %v413_v10  ;;  %v390_v30 = vld [vmem:[%s2445_s27 + $0xa8] sm:$0xff]  ;;  %v389_v32 = vld [vmem:[%s2445_s27 + $0xa0] sm:$0xff]  ;;  %v412_v33 = vld [vmem:[%s2445_s27 + $0x158] sm:$0xff]  ;;  %667 = vmatpush1.msra.mxu1 %v415_v31 }
  0xa0   : > { %507 = vmatprep.subr.mxu0 %v410_v11  ;;  %v386_v34 = vld [vmem:[%s2445_s27 + $0x88] sm:$0xff]  ;;  %v411_v35 = vld [vmem:[%s2445_s27 + $0x150] sm:$0xff]  ;;  %v385_v36 = vld [vmem:[%s2445_s27 + $0x80] sm:$0xff]  ;;  %668 = vmatprep.subr.mxu1 %v412_v33 }
  0xa1   : > { %508 = vmatpush1.msra.mxu0 %v409_v12  ;;  %v408_v37 = vld [vmem:[%s2445_s27 + $0x138] sm:$0xff]  ;;  %v382_v38 = vld [vmem:[%s2445_s27 + $0x68] sm:$0xff]  ;;  %v407_v39 = vld [vmem:[%s2445_s27 + $0x130] sm:$0xff]  ;;  %669 = vmatpush1.msra.mxu1 %v411_v35 }
  0xa2   : > { %509 = vmatprep.subr.mxu0 %v406_v13  ;;  %v381_v40 = vld [vmem:[%s2445_s27 + $0x60] sm:$0xff]  ;;  %v404_v41 = vld [vmem:[%s2445_s27 + $0x118] sm:$0xff]  ;;  %v378_v42 = vld [vmem:[%s2445_s27 + $0x48] sm:$0xff]  ;;  %670 = vmatprep.subr.mxu1 %v408_v37 }
  0xa3   : > { %510 = vmatpush1.msra.mxu0 %v405_v14  ;;  %v403_v43 = vld [vmem:[%s2445_s27 + $0x110] sm:$0xff]  ;;  %v377_v44 = vld [vmem:[%s2445_s27 + $0x40] sm:$0xff]  ;;  %671 = vmatpush1.msra.mxu1 %v407_v39  ;;  %v400_v45 = vld [vmem:[%s2445_s27 + $0xf8] sm:$0xff] }
  0xa4   : > { %511 = vmatprep.subr.mxu0 %v402_v17  ;;  %v374_v46 = vld [vmem:[%s2445_s27 + $0x28] sm:$0xff]  ;;  %672 = vmatprep.subr.mxu1 %v404_v41  ;;  %v399_v47 = vld [vmem:[%s2445_s27 + $0xf0] sm:$0xff]  ;;  %v373_v48 = vld [vmem:[%s2445_s27 + $0x20] sm:$0xff] }
  0xa5   : > { %512 = vmatpush1.msra.mxu0 %v401_v19  ;;  %673 = vmatpush1.msra.mxu1 %v403_v43  ;;  %v396_v49 = vld [vmem:[%s2445_s27 + $0xd8] sm:$0xff]  ;;  %v370_v50 = vld [vmem:[%s2445_s27 + $0x8] sm:$0xff]  ;;  %v395_v51 = vld [vmem:[%s2445_s27 + $0xd0] sm:$0xff] }
  0xa6   : > { %513 = vmatprep.subr.mxu0 %v398_v22  ;;  %674 = vmatprep.subr.mxu1 %v400_v45  ;;  %v369_v52 = vld [vmem:[%s2445_s27] sm:$0xff]  ;;  %v392_v53 = vld [vmem:[%s2445_s27 + $0xb8] sm:$0xff]  ;;  %v494_v54 = vld [vmem:[%s2445_s27 + $0x3e8] sm:$0xff] }
  0xa7   : > { %514 = vmatpush1.msra.mxu0 %v397_v24  ;;  %675 = vmatpush1.msra.mxu1 %v399_v47  ;;  %v391_v55 = vld [vmem:[%s2445_s27 + $0xb0] sm:$0xff]  ;;  %v493_v56 = vld [vmem:[%s2445_s27 + $0x3e0] sm:$0xff]  ;;  %v388_v57 = vld [vmem:[%s2445_s27 + $0x98] sm:$0xff] }
  0xa8   : > { %515 = vmatprep.subr.mxu0 %v394_v26  ;;  %676 = vmatprep.subr.mxu1 %v396_v49  ;;  %v490_v58 = vld [vmem:[%s2445_s27 + $0x3c8] sm:$0xff]  ;;  %v387_v59 = vld [vmem:[%s2445_s27 + $0x90] sm:$0xff]  ;;  %v489_v60 = vld [vmem:[%s2445_s27 + $0x3c0] sm:$0xff] }
  0xa9   : > { %516 = vmatpush1.msra.mxu0 %v393_v28  ;;  %677 = vmatpush1.msra.mxu1 %v395_v51  ;;  %v384_v61 = vld [vmem:[%s2445_s27 + $0x78] sm:$0xff]  ;;  %v486_v62 = vld [vmem:[%s2445_s27 + $0x3a8] sm:$0xff]  ;;  %v383_v63 = vld [vmem:[%s2445_s27 + $0x70] sm:$0xff] }
  0xaa   : > { %517 = vmatprep.subr.mxu0 %v390_v30  ;;  %678 = vmatprep.subr.mxu1 %v392_v53  ;;  %v485_v0 = vld [vmem:[%s2445_s27 + $0x3a0] sm:$0xff]  ;;  %v380_v1 = vld [vmem:[%s2445_s27 + $0x58] sm:$0xff]  ;;  %v482_v2 = vld [vmem:[%s2445_s27 + $0x388] sm:$0xff] }
  0xab   : > { %518 = vmatpush1.msra.mxu0 %v389_v32  ;;  %679 = vmatpush1.msra.mxu1 %v391_v55  ;;  %v379_v3 = vld [vmem:[%s2445_s27 + $0x50] sm:$0xff]  ;;  %v481_v4 = vld [vmem:[%s2445_s27 + $0x380] sm:$0xff]  ;;  %v376_v5 = vld [vmem:[%s2445_s27 + $0x38] sm:$0xff] }
  0xac   : > { %519 = vmatprep.subr.mxu0 %v386_v34  ;;  %680 = vmatprep.subr.mxu1 %v388_v57  ;;  %v478_v6 = vld [vmem:[%s2445_s27 + $0x368] sm:$0xff]  ;;  %v375_v7 = vld [vmem:[%s2445_s27 + $0x30] sm:$0xff]  ;;  %v477_v8 = vld [vmem:[%s2445_s27 + $0x360] sm:$0xff] }
  0xad   : > { %520 = vmatpush1.msra.mxu0 %v385_v36  ;;  %681 = vmatpush1.msra.mxu1 %v387_v59  ;;  %v372_v9 = vld [vmem:[%s2445_s27 + $0x18] sm:$0xff]  ;;  %v474_v10 = vld [vmem:[%s2445_s27 + $0x348] sm:$0xff]  ;;  %v473_v12 = vld [vmem:[%s2445_s27 + $0x340] sm:$0xff] }
  0xae   : > { %521 = vmatprep.subr.mxu0 %v382_v38  ;;  %682 = vmatprep.subr.mxu1 %v384_v61  ;;  %v2531_v11 = vld [vmem:[%s2437_s6 + $0x8] sm:$0xff]  ;;  %v371_v13 = vld [vmem:[%s2445_s27 + $0x10] sm:$0xff]  ;;  %v496_v15 = vld [vmem:[%s2445_s27 + $0x3f8] sm:$0xff] }
  0xaf   : > { %522 = vmatpush1.msra.mxu0 %v381_v40  ;;  %683 = vmatpush1.msra.mxu1 %v383_v63  ;;  %v470_v14 = vld [vmem:[%s2445_s27 + $0x328] sm:$0xff]  ;;  %v469_v16 = vld [vmem:[%s2445_s27 + $0x320] sm:$0xff]  ;;  %v495_v17 = vld [vmem:[%s2445_s27 + $0x3f0] sm:$0xff] }
  0xb0   : > { %523 = vmatprep.subr.mxu0 %v378_v42  ;;  %684 = vmatprep.subr.mxu1 %v380_v1  ;;  %v466_v18 = vld [vmem:[%s2445_s27 + $0x308] sm:$0xff]  ;;  %v492_v19 = vld [vmem:[%s2445_s27 + $0x3d8] sm:$0xff]  ;;  %v465_v20 = vld [vmem:[%s2445_s27 + $0x300] sm:$0xff] }
  0xb1   : > { %524 = vmatpush1.msra.mxu0 %v377_v44  ;;  %685 = vmatpush1.msra.mxu1 %v379_v3  ;;  %v491_v21 = vld [vmem:[%s2445_s27 + $0x3d0] sm:$0xff]  ;;  %v462_v22 = vld [vmem:[%s2445_s27 + $0x2e8] sm:$0xff]  ;;  %v488_v23 = vld [vmem:[%s2445_s27 + $0x3b8] sm:$0xff] }
  0xb2   : > { %525 = vmatprep.subr.mxu0 %v374_v46  ;;  %686 = vmatprep.subr.mxu1 %v376_v5  ;;  %v461_v24 = vld [vmem:[%s2445_s27 + $0x2e0] sm:$0xff]  ;;  %v487_v25 = vld [vmem:[%s2445_s27 + $0x3b0] sm:$0xff]  ;;  %v458_v26 = vld [vmem:[%s2445_s27 + $0x2c8] sm:$0xff] }
  0xb3   : > { %526 = vmatpush1.msra.mxu0 %v373_v48  ;;  %687 = vmatpush1.msra.mxu1 %v375_v7  ;;  %v484_v27 = vld [vmem:[%s2445_s27 + $0x398] sm:$0xff]  ;;  %v457_v28 = vld [vmem:[%s2445_s27 + $0x2c0] sm:$0xff]  ;;  %v483_v29 = vld [vmem:[%s2445_s27 + $0x390] sm:$0xff] }
  0xb4   : > { %527 = vmatprep.subr.mxu0 %v370_v50  ;;  %688 = vmatprep.subr.mxu1 %v372_v9  ;;  %v454_v30 = vld [vmem:[%s2445_s27 + $0x2a8] sm:$0xff]  ;;  %v480_v31 = vld [vmem:[%s2445_s27 + $0x378] sm:$0xff]  ;;  %v453_v32 = vld [vmem:[%s2445_s27 + $0x2a0] sm:$0xff] }
  0xb5   : > { %528 = vmatpush1.msra.mxu0 %v369_v52  ;;  %561 = vmatprep.mubr.f32.mxu0 %v2531_v11  ;;  %v479_v33 = vld [vmem:[%s2445_s27 + $0x370] sm:$0xff]  ;;  %v450_v34 = vld [vmem:[%s2445_s27 + $0x288] sm:$0xff]  ;;  %v476_v35 = vld [vmem:[%s2445_s27 + $0x358] sm:$0xff] }
  0xb6   : > { %529 = vmatprep.subr.mxu0 %v494_v54  ;;  %689 = vmatpush1.msra.mxu1 %v371_v13  ;;  %v449_v36 = vld [vmem:[%s2445_s27 + $0x280] sm:$0xff]  ;;  %v475_v37 = vld [vmem:[%s2445_s27 + $0x350] sm:$0xff]  ;;  %v446_v38 = vld [vmem:[%s2445_s27 + $0x268] sm:$0xff] }
  0xb7   : > { %530 = vmatpush2.msra.mxu0 %v493_v56  ;;  %690 = vmatprep.subr.mxu1 %v496_v15  ;;  %v472_v39 = vld [vmem:[%s2445_s27 + $0x338] sm:$0xff]  ;;  %v445_v40 = vld [vmem:[%s2445_s27 + $0x260] sm:$0xff]  ;;  %v471_v41 = vld [vmem:[%s2445_s27 + $0x330] sm:$0xff] }
  0xb8   : > { %531 = vmatprep.subr.mxu0 %v490_v58  ;;  %691 = vmatpush2.msra.mxu1 %v495_v17  ;;  %v442_v42 = vld [vmem:[%s2445_s27 + $0x248] sm:$0xff]  ;;  %v468_v43 = vld [vmem:[%s2445_s27 + $0x318] sm:$0xff]  ;;  %v441_v44 = vld [vmem:[%s2445_s27 + $0x240] sm:$0xff] }
  0xb9   : > { %532 = vmatpush2.msra.mxu0 %v489_v60  ;;  %692 = vmatprep.subr.mxu1 %v492_v19  ;;  %v467_v45 = vld [vmem:[%s2445_s27 + $0x310] sm:$0xff]  ;;  %v438_v46 = vld [vmem:[%s2445_s27 + $0x228] sm:$0xff]  ;;  %v464_v47 = vld [vmem:[%s2445_s27 + $0x2f8] sm:$0xff] }
  0xba   : > { %533 = vmatprep.subr.mxu0 %v486_v62  ;;  %693 = vmatpush2.msra.mxu1 %v491_v21  ;;  %v437_v48 = vld [vmem:[%s2445_s27 + $0x220] sm:$0xff]  ;;  %v463_v49 = vld [vmem:[%s2445_s27 + $0x2f0] sm:$0xff]  ;;  %v434_v50 = vld [vmem:[%s2445_s27 + $0x208] sm:$0xff] }
  0xbb   : > { %534 = vmatpush2.msra.mxu0 %v485_v0  ;;  %694 = vmatprep.subr.mxu1 %v488_v23  ;;  %v460_v51 = vld [vmem:[%s2445_s27 + $0x2d8] sm:$0xff]  ;;  %v433_v52 = vld [vmem:[%s2445_s27 + $0x200] sm:$0xff]  ;;  %v459_v53 = vld [vmem:[%s2445_s27 + $0x2d0] sm:$0xff] }
  0xbc   : > { %535 = vmatprep.subr.mxu0 %v482_v2  ;;  %695 = vmatpush2.msra.mxu1 %v487_v25  ;;  %v337_v54 = vld [vmem:[%s2437_s6] sm:$0xff]  ;;  %v456_v55 = vld [vmem:[%s2445_s27 + $0x2b8] sm:$0xff]  ;;  %v455_v57 = vld [vmem:[%s2445_s27 + $0x2b0] sm:$0xff] }
  0xbd   : > { %536 = vmatpush2.msra.mxu0 %v481_v4  ;;  %696 = vmatprep.subr.mxu1 %v484_v27  ;;  %v340_v56 = vld [vmem:[%s2437_s6 + $0x18] sm:$0xff]  ;;  %v451_v59 = vld [vmem:[%s2445_s27 + $0x290] sm:$0xff]  ;;  %v342_v63 = vld [vmem:[%s2437_s6 + $0x28] sm:$0xff] }
  0xbe   : > { %537 = vmatprep.subr.mxu0 %v478_v6  ;;  %697 = vmatpush2.msra.mxu1 %v483_v29  ;;  %v452_v58 = vld [vmem:[%s2445_s27 + $0x298] sm:$0xff]  ;;  %v339_v61 = vld [vmem:[%s2437_s6 + $0x10] sm:$0xff]  ;;  %v1136_v4 = vld [vmem:[%s2451_s25 + $0xe8] sm:$0xff] }
  0xbf   : > { %538 = vmatpush2.msra.mxu0 %v477_v8  ;;  %698 = vmatprep.subr.mxu1 %v480_v31  ;;  %v1138_v60 = vld [vmem:[%s2451_s25 + $0xf8] sm:$0xff]  ;;  %v447_v0 = vld [vmem:[%s2445_s27 + $0x270] sm:$0xff]  ;;  %v341_v5 = vld [vmem:[%s2437_s6 + $0x20] sm:$0xff] }
  0xc0   : > { %539 = vmatprep.subr.mxu0 %v474_v10  ;;  %699 = vmatpush2.msra.mxu1 %v479_v33  ;;  %v448_v62 = vld [vmem:[%s2445_s27 + $0x278] sm:$0xff]  ;;  %v1137_v2 = vld [vmem:[%s2451_s25 + $0xf0] sm:$0xff]  ;;  %v1135_v10 = vld [vmem:[%s2451_s25 + $0xe0] sm:$0xff] }
  0xc1   : > { %540 = vmatpush2.msra.mxu0 %v473_v12  ;;  %700 = vmatprep.subr.mxu1 %v476_v35  ;;  %v444_v1 = vld [vmem:[%s2445_s27 + $0x258] sm:$0xff]  ;;  %v443_v3 = vld [vmem:[%s2445_s27 + $0x250] sm:$0xff]  ;;  %v345_v17 = vld [vmem:[%s2437_s6 + $0x40] sm:$0xff] }
  0xc2   : > { %541 = vmatprep.subr.mxu0 %v470_v14  ;;  %701 = vmatpush2.msra.mxu1 %v475_v37  ;;  %v440_v6 = vld [vmem:[%s2445_s27 + $0x238] sm:$0xff]  ;;  %v439_v8 = vld [vmem:[%s2445_s27 + $0x230] sm:$0xff]  ;;  %v346_v14 = vld [vmem:[%s2437_s6 + $0x48] sm:$0xff] }
  0xc3   : > { %542 = vmatpush2.msra.mxu0 %v469_v16  ;;  %702 = vmatprep.subr.mxu1 %v472_v39  ;;  %v344_v7 = vld [vmem:[%s2437_s6 + $0x38] sm:$0xff]  ;;  %v343_v13 = vld [vmem:[%s2437_s6 + $0x30] sm:$0xff]  ;;  %v1132_v16 = vld [vmem:[%s2451_s25 + $0xc8] sm:$0xff] }
  0xc4   : > { %543 = vmatprep.subr.mxu0 %v466_v18  ;;  %703 = vmatpush2.msra.mxu1 %v471_v41  ;;  %v436_v9 = vld [vmem:[%s2445_s27 + $0x218] sm:$0xff]  ;;  %v1133_v15 = vld [vmem:[%s2451_s25 + $0xd0] sm:$0xff]  ;;  %v1131_v19 = vld [vmem:[%s2451_s25 + $0xc0] sm:$0xff] }
  0xc5   : > { %544 = vmatpush2.msra.mxu0 %v465_v20  ;;  %704 = vmatprep.subr.mxu1 %v468_v43  ;;  %v1134_v12 = vld [vmem:[%s2451_s25 + $0xd8] sm:$0xff]  ;;  %v347_v21 = vld [vmem:[%s2437_s6 + $0x50] sm:$0xff]  ;;  %v349_v25 = vld [vmem:[%s2437_s6 + $0x60] sm:$0xff] }
  0xc6   : > { %545 = vmatprep.subr.mxu0 %v462_v22  ;;  %705 = vmatpush2.msra.mxu1 %v467_v45  ;;  %v348_v18 = vld [vmem:[%s2437_s6 + $0x58] sm:$0xff]  ;;  %v350_v22 = vld [vmem:[%s2437_s6 + $0x68] sm:$0xff]  ;;  %v1129_v23 = vld [vmem:[%s2451_s25 + $0xb0] sm:$0xff] }
  0xc7   : > { %546 = vmatpush2.msra.mxu0 %v461_v24  ;;  %706 = vmatprep.subr.mxu1 %v464_v47  ;;  %v1130_v20 = vld [vmem:[%s2451_s25 + $0xb8] sm:$0xff]  ;;  %v1128_v24 = vld [vmem:[%s2451_s25 + $0xa8] sm:$0xff]  ;;  %v1127_v27 = vld [vmem:[%s2451_s25 + $0xa0] sm:$0xff] }
  0xc8   : > { %547 = vmatprep.subr.mxu0 %v458_v26  ;;  %707 = vmatpush2.msra.mxu1 %v463_v49  ;;  %v352_v26 = vld [vmem:[%s2437_s6 + $0x78] sm:$0xff]  ;;  %v351_v29 = vld [vmem:[%s2437_s6 + $0x70] sm:$0xff]  ;;  %v353_v33 = vld [vmem:[%s2437_s6 + $0x80] sm:$0xff] }
  0xc9   : > { %548 = vmatpush2.msra.mxu0 %v457_v28  ;;  %708 = vmatprep.subr.mxu1 %v460_v51  ;;  %v1126_v28 = vld [vmem:[%s2451_s25 + $0x98] sm:$0xff]  ;;  %v1125_v31 = vld [vmem:[%s2451_s25 + $0x90] sm:$0xff]  ;;  %v1123_v35 = vld [vmem:[%s2451_s25 + $0x80] sm:$0xff] }
  0xca   : > { %549 = vmatprep.subr.mxu0 %v454_v30  ;;  %709 = vmatpush2.msra.mxu1 %v459_v53  ;;  %v354_v30 = vld [vmem:[%s2437_s6 + $0x88] sm:$0xff]  ;;  %v355_v37 = vld [vmem:[%s2437_s6 + $0x90] sm:$0xff]  ;;  %v357_v41 = vld [vmem:[%s2437_s6 + $0xa0] sm:$0xff] }
  0xcb   : > { %550 = vmatpush2.msra.mxu0 %v453_v32  ;;  %710 = vmatprep.subr.mxu1 %v456_v55  ;;  %v1124_v32 = vld [vmem:[%s2451_s25 + $0x88] sm:$0xff]  ;;  %v1121_v39 = vld [vmem:[%s2451_s25 + $0x70] sm:$0xff]  ;;  %v1119_v43 = vld [vmem:[%s2451_s25 + $0x60] sm:$0xff] }
  0xcc   : > { %551 = vmatprep.subr.mxu0 %v450_v34  ;;  %711 = vmatpush2.msra.mxu1 %v455_v57  ;;  %v356_v34 = vld [vmem:[%s2437_s6 + $0x98] sm:$0xff]  ;;  %v359_v45 = vld [vmem:[%s2437_s6 + $0xb0] sm:$0xff]  ;;  %v361_v49 = vld [vmem:[%s2437_s6 + $0xc0] sm:$0xff] }
  0xcd   : > { %552 = vmatpush2.msra.mxu0 %v449_v36  ;;  %712 = vmatprep.subr.mxu1 %v452_v58  ;;  %v1122_v36 = vld [vmem:[%s2451_s25 + $0x78] sm:$0xff]  ;;  %v1117_v47 = vld [vmem:[%s2451_s25 + $0x50] sm:$0xff]  ;;  %v1115_v51 = vld [vmem:[%s2451_s25 + $0x40] sm:$0xff] }
  0xce   : > { %553 = vmatprep.subr.mxu0 %v446_v38  ;;  %722 = vmatprep.mubr.f32.mxu1 %v2531_v11  ;;  %v435_v11 = vld [vmem:[%s2445_s27 + $0x210] sm:$0xff]  ;;  %v358_v38 = vld [vmem:[%s2437_s6 + $0xa8] sm:$0xff]  ;;  %v368_v55 = vld [vmem:[%s2437_s6 + $0xf8] sm:$0xff] }
  0xcf   : > { %554 = vmatpush2.msra.mxu0 %v445_v40  ;;  %713 = vmatpush2.msra.mxu1 %v451_v59  ;;  %v1120_v40 = vld [vmem:[%s2451_s25 + $0x68] sm:$0xff]  ;;  %v1114_v57 = vld [vmem:[%s2451_s25 + $0x38] sm:$0xff]  ;;  %v1113_v58 = vld [vmem:[%s2451_s25 + $0x30] sm:$0xff] }
  0xd0   : > { %555 = vmatprep.subr.mxu0 %v442_v42  ;;  %714 = vmatprep.subr.mxu1 %v448_v62  ;;  %v360_v42 = vld [vmem:[%s2437_s6 + $0xb8] sm:$0xff]  ;;  %v366_v53 = vld [vmem:[%s2437_s6 + $0xe8] sm:$0xff]  ;;  %v1109_v62 = vld [vmem:[%s2451_s25 + $0x10] sm:$0xff] }
  0xd1   : > { %556 = vmatpush2.msra.mxu0 %v441_v44  ;;  %715 = vmatpush2.msra.mxu1 %v447_v0  ;;  %v1118_v44 = vld [vmem:[%s2451_s25 + $0x58] sm:$0xff]  ;;  %v1112_v59 = vld [vmem:[%s2451_s25 + $0x28] sm:$0xff]  ;;  %v1107_v0 = vld [vmem:[%s2451_s25] sm:$0xff] }
  0xd2   : > { %557 = vmatprep.subr.mxu0 %v438_v46  ;;  %716 = vmatprep.subr.mxu1 %v444_v1  ;;  %v362_v46 = vld [vmem:[%s2437_s6 + $0xc8] sm:$0xff]  ;;  %v1170_v1 = vld [vmem:[%s2451_s25 + $0x1f8] sm:$0xff] }
  0xd3   : > { %558 = vmatpush2.msra.mxu0 %v437_v48  ;;  %717 = vmatpush2.msra.mxu1 %v443_v3  ;;  %v1116_v48 = vld [vmem:[%s2451_s25 + $0x48] sm:$0xff] }
  0xd4   : > { %559 = vmatprep.subr.mxu0 %v434_v50  ;;  %718 = vmatprep.subr.mxu1 %v440_v6  ;;  %v364_v50 = vld [vmem:[%s2437_s6 + $0xd8] sm:$0xff]  ;;  %v1168_v3 = vld [vmem:[%s2451_s25 + $0x1e8] sm:$0xff]  ;;  %v1165_v6 = vld [vmem:[%s2451_s25 + $0x1d0] sm:$0xff] }
  0xd5   : > { %560 = vmatpush2.msra.mxu0 %v433_v52  ;;  %719 = vmatpush2.msra.mxu1 %v439_v8  ;;  %v363_v52 = vld [vmem:[%s2437_s6 + $0xd0] sm:$0xff]  ;;  %v1163_v8 = vld [vmem:[%s2451_s25 + $0x1c0] sm:$0xff] }
  0xd6   : > { %562 = vmatmul.mubr.f32.vlgmr.msra.gmra.mxu0 %v337_v54  ;;  %1171 = vmatprep.subr.mxu0 %v1138_v60 }
  0xd7   : > { %567 = vmatprep.mubr.f32.mxu0 %v340_v56  ;;  %1172 = vmatpush1.msra.mxu0 %v1137_v2 }
  0xd8   : > { %1173 = vmatprep.subr.mxu0 %v1136_v4  ;;  %720 = vmatprep.subr.mxu1 %v436_v9  ;;  %v1162_v9 = vld [vmem:[%s2451_s25 + $0x1b8] sm:$0xff] }
  0xd9   : > { %1174 = vmatpush1.msra.mxu0 %v1135_v10  ;;  %721 = vmatpush2.msra.mxu1 %v435_v11  ;;  %v1160_v11 = vld [vmem:[%s2451_s25 + $0x1a8] sm:$0xff] }
  0xda   : > { %568 = vmatmul.mubr.f32.gmra.mxu0 %v339_v61  ;;  %1175 = vmatprep.subr.mxu0 %v1134_v12 }
  0xdb   : > { %573 = vmatprep.mubr.f32.mxu0 %v342_v63  ;;  %723 = vmatmul.mubr.f32.vlgmr.msra.gmra.mxu1 %v337_v54  ;;  %v365_v54 = vld [vmem:[%s2437_s6 + $0xe0] sm:$0xff] }
  0xdc   : > { %728 = vmatprep.mubr.f32.mxu1 %v340_v56  ;;  %1176 = vmatpush1.msra.mxu0 %v1133_v15  ;;  %v367_v56 = vld [vmem:[%s2437_s6 + $0xf0] sm:$0xff] }
  0xdd   : > { %1692 = vmatprep.subr.mxu1 %v1138_v60  ;;  %1177 = vmatprep.subr.mxu0 %v1132_v16  ;;  %v1111_v60 = vld [vmem:[%s2451_s25 + $0x20] sm:$0xff] }
  0xde   : > { %574 = vmatmul.mubr.f32.gmra.mxu0 %v341_v5  ;;  %1724 = vmatpush1.msra.mxu1 %v1137_v2  ;;  %v1169_v2 = vld [vmem:[%s2451_s25 + $0x1f0] sm:$0xff] }
  0xdf   : > { %579 = vmatprep.mubr.f32.mxu0 %v344_v7  ;;  %729 = vmatmul.mubr.f32.gmra.mxu1 %v339_v61  ;;  %v1110_v61 = vld [vmem:[%s2451_s25 + $0x18] sm:$0xff] }
  0xe0   : > { %734 = vmatprep.mubr.f32.mxu1 %v342_v63  ;;  %1178 = vmatpush1.msra.mxu0 %v1131_v19  ;;  %v1108_v63 = vld [vmem:[%s2451_s25 + $0x8] sm:$0xff] }
  0xe1   : > { %1693 = vmatprep.subr.mxu1 %v1136_v4  ;;  %1179 = vmatprep.subr.mxu0 %v1130_v20  ;;  %v1167_v4 = vld [vmem:[%s2451_s25 + $0x1e0] sm:$0xff] }
  0xe2   : > { %580 = vmatmul.mubr.f32.gmra.mxu0 %v343_v13  ;;  %1725 = vmatpush1.msra.mxu1 %v1135_v10  ;;  %v1161_v10 = vld [vmem:[%s2451_s25 + $0x1b0] sm:$0xff] }
  0xe3   : > { %585 = vmatprep.mubr.f32.mxu0 %v346_v14  ;;  %735 = vmatmul.mubr.f32.gmra.mxu1 %v341_v5  ;;  %v1166_v5 = vld [vmem:[%s2451_s25 + $0x1d8] sm:$0xff] }
  0xe4   : > { %740 = vmatprep.mubr.f32.mxu1 %v344_v7  ;;  %1180 = vmatpush1.msra.mxu0 %v1129_v23  ;;  %v1164_v7 = vld [vmem:[%s2451_s25 + $0x1c8] sm:$0xff] }
  0xe5   : > { %1694 = vmatprep.subr.mxu1 %v1134_v12  ;;  %1181 = vmatprep.subr.mxu0 %v1128_v24  ;;  %v1159_v12 = vld [vmem:[%s2451_s25 + $0x1a0] sm:$0xff] }
  0xe6   : > { %586 = vmatmul.mubr.f32.gmra.mxu0 %v345_v17  ;;  %1726 = vmatpush1.msra.mxu1 %v1133_v15  ;;  %v1156_v15 = vld [vmem:[%s2451_s25 + $0x188] sm:$0xff] }
  0xe7   : > { %591 = vmatprep.mubr.f32.mxu0 %v348_v18  ;;  %741 = vmatmul.mubr.f32.gmra.mxu1 %v343_v13  ;;  %v1158_v13 = vld [vmem:[%s2451_s25 + $0x198] sm:$0xff] }
  0xe8   : > { %746 = vmatprep.mubr.f32.mxu1 %v346_v14  ;;  %1182 = vmatpush1.msra.mxu0 %v1127_v27  ;;  %v1157_v14 = vld [vmem:[%s2451_s25 + $0x190] sm:$0xff] }
  0xe9   : > { %1695 = vmatprep.subr.mxu1 %v1132_v16  ;;  %1183 = vmatprep.subr.mxu0 %v1126_v28  ;;  %v1155_v16 = vld [vmem:[%s2451_s25 + $0x180] sm:$0xff] }
  0xea   : > { %592 = vmatmul.mubr.f32.gmra.mxu0 %v347_v21  ;;  %1727 = vmatpush1.msra.mxu1 %v1131_v19  ;;  %v1152_v19 = vld [vmem:[%s2451_s25 + $0x168] sm:$0xff] }
  0xeb   : > { %597 = vmatprep.mubr.f32.mxu0 %v350_v22  ;;  %747 = vmatmul.mubr.f32.gmra.mxu1 %v345_v17  ;;  %v1154_v17 = vld [vmem:[%s2451_s25 + $0x178] sm:$0xff] }
  0xec   : > { %752 = vmatprep.mubr.f32.mxu1 %v348_v18  ;;  %1184 = vmatpush1.msra.mxu0 %v1125_v31  ;;  %v1153_v18 = vld [vmem:[%s2451_s25 + $0x170] sm:$0xff] }
  0xed   : > { %1696 = vmatprep.subr.mxu1 %v1130_v20  ;;  %1185 = vmatprep.subr.mxu0 %v1124_v32  ;;  %v1151_v20 = vld [vmem:[%s2451_s25 + $0x160] sm:$0xff] }
  0xee   : > { %598 = vmatmul.mubr.f32.gmra.mxu0 %v349_v25  ;;  %1728 = vmatpush1.msra.mxu1 %v1129_v23  ;;  %v1148_v23 = vld [vmem:[%s2451_s25 + $0x148] sm:$0xff] }
  0xef   : > { %603 = vmatprep.mubr.f32.mxu0 %v352_v26  ;;  %753 = vmatmul.mubr.f32.gmra.mxu1 %v347_v21  ;;  %v1150_v21 = vld [vmem:[%s2451_s25 + $0x158] sm:$0xff] }
  0xf0   : > { %758 = vmatprep.mubr.f32.mxu1 %v350_v22  ;;  %1186 = vmatpush1.msra.mxu0 %v1123_v35  ;;  %v1149_v22 = vld [vmem:[%s2451_s25 + $0x150] sm:$0xff] }
  0xf1   : > { %1697 = vmatprep.subr.mxu1 %v1128_v24  ;;  %1187 = vmatprep.subr.mxu0 %v1122_v36  ;;  %v1147_v24 = vld [vmem:[%s2451_s25 + $0x140] sm:$0xff] }
  0xf2   : > { %604 = vmatmul.mubr.f32.gmra.mxu0 %v351_v29  ;;  %1729 = vmatpush1.msra.mxu1 %v1127_v27  ;;  %v1144_v27 = vld [vmem:[%s2451_s25 + $0x128] sm:$0xff] }
  0xf3   : > { %609 = vmatprep.mubr.f32.mxu0 %v354_v30  ;;  %759 = vmatmul.mubr.f32.gmra.mxu1 %v349_v25  ;;  %v1146_v25 = vld [vmem:[%s2451_s25 + $0x138] sm:$0xff] }
  0xf4   : > { %764 = vmatprep.mubr.f32.mxu1 %v352_v26  ;;  %1188 = vmatpush1.msra.mxu0 %v1121_v39  ;;  %v1145_v26 = vld [vmem:[%s2451_s25 + $0x130] sm:$0xff] }
  0xf5   : > { %1698 = vmatprep.subr.mxu1 %v1126_v28  ;;  %1189 = vmatprep.subr.mxu0 %v1120_v40  ;;  %v1143_v28 = vld [vmem:[%s2451_s25 + $0x120] sm:$0xff] }
  0xf6   : > { %610 = vmatmul.mubr.f32.gmra.mxu0 %v353_v33  ;;  %1730 = vmatpush1.msra.mxu1 %v1125_v31  ;;  %v1140_v31 = vld [vmem:[%s2451_s25 + $0x108] sm:$0xff] }
  0xf7   : > { %615 = vmatprep.mubr.f32.mxu0 %v356_v34  ;;  %765 = vmatmul.mubr.f32.gmra.mxu1 %v351_v29  ;;  %v1142_v29 = vld [vmem:[%s2451_s25 + $0x118] sm:$0xff] }
  0xf8   : > { %770 = vmatprep.mubr.f32.mxu1 %v354_v30  ;;  %1190 = vmatpush1.msra.mxu0 %v1119_v43  ;;  %v1141_v30 = vld [vmem:[%s2451_s25 + $0x110] sm:$0xff] }
  0xf9   : > { %1699 = vmatprep.subr.mxu1 %v1124_v32  ;;  %1191 = vmatprep.subr.mxu0 %v1118_v44  ;;  %v1139_v32 = vld [vmem:[%s2451_s25 + $0x100] sm:$0xff] }
  0xfa   : > { %616 = vmatmul.mubr.f32.gmra.mxu0 %v355_v37  ;;  %1731 = vmatpush1.msra.mxu1 %v1123_v35 }
  0xfb   : > { %621 = vmatprep.mubr.f32.mxu0 %v358_v38  ;;  %771 = vmatmul.mubr.f32.gmra.mxu1 %v353_v33 }
  0xfc   : > { %776 = vmatprep.mubr.f32.mxu1 %v356_v34  ;;  %1192 = vmatpush1.msra.mxu0 %v1117_v47 }
  0xfd   : > { %1700 = vmatprep.subr.mxu1 %v1122_v36  ;;  %1193 = vmatprep.subr.mxu0 %v1116_v48 }
  0xfe   : > { %622 = vmatmul.mubr.f32.gmra.mxu0 %v357_v41  ;;  %1732 = vmatpush1.msra.mxu1 %v1121_v39 }
  0xff   : > { %627 = vmatprep.mubr.f32.mxu0 %v360_v42  ;;  %777 = vmatmul.mubr.f32.gmra.mxu1 %v355_v37 }
 0x100   : > { %782 = vmatprep.mubr.f32.mxu1 %v358_v38  ;;  %1194 = vmatpush1.msra.mxu0 %v1115_v51 }
 0x101   : > { %1701 = vmatprep.subr.mxu1 %v1120_v40  ;;  %1195 = vmatprep.subr.mxu0 %v1114_v57 }
 0x102   : > { %628 = vmatmul.mubr.f32.gmra.mxu0 %v359_v45  ;;  %1733 = vmatpush1.msra.mxu1 %v1119_v43 }
 0x103   : > { %633 = vmatprep.mubr.f32.mxu0 %v362_v46  ;;  %783 = vmatmul.mubr.f32.gmra.mxu1 %v357_v41 }
 0x104   : > { %788 = vmatprep.mubr.f32.mxu1 %v360_v42  ;;  %1702 = vmatprep.subr.mxu1 %v1118_v44 }
 0x105   : > { %1734 = vmatpush1.msra.mxu1 %v1117_v47  ;;  %1196 = vmatpush1.msra.mxu0 %v1113_v58 }
 0x106   : > { %634 = vmatmul.mubr.f32.gmra.mxu0 %v361_v49  ;;  %1703 = vmatprep.subr.mxu1 %v1116_v48 }
 0x107   : > { %639 = vmatprep.mubr.f32.mxu0 %v364_v50  ;;  %789 = vmatmul.mubr.f32.gmra.mxu1 %v359_v45 }
 0x108   : > { %794 = vmatprep.mubr.f32.mxu1 %v362_v46  ;;  %1735 = vmatpush1.msra.mxu1 %v1115_v51 }
 0x109   : > { %1197 = vmatprep.subr.mxu0 %v1112_v59  ;;  %1704 = vmatprep.subr.mxu1 %v1114_v57 }
 0x10a   : > { %640 = vmatmul.mubr.f32.gmra.mxu0 %v363_v52  ;;  %1736 = vmatpush1.msra.mxu1 %v1113_v58 }
 0x10b   : > { %645 = vmatprep.mubr.f32.mxu0 %v366_v53  ;;  %795 = vmatmul.mubr.f32.gmra.mxu1 %v361_v49 }
 0x10c   : > { %800 = vmatprep.mubr.f32.mxu1 %v364_v50  ;;  %1198 = vmatpush1.msra.mxu0 %v1111_v60 }
 0x10d   : > { %1199 = vmatprep.subr.mxu0 %v1110_v61  ;;  %1705 = vmatprep.subr.mxu1 %v1112_v59 }
 0x10e   : > { %646 = vmatmul.mubr.f32.gmra.mxu0 %v365_v54  ;;  %1737 = vmatpush1.msra.mxu1 %v1111_v60 }
 0x10f   : > { %651 = vmatprep.mubr.f32.mxu0 %v368_v55  ;;  %801 = vmatmul.mubr.f32.gmra.mxu1 %v363_v52 }
 0x110   : > { %806 = vmatprep.mubr.f32.mxu1 %v366_v53  ;;  %1200 = vmatpush1.msra.mxu0 %v1109_v62 }
 0x111   : > { %1201 = vmatprep.subr.mxu0 %v1108_v63  ;;  %1706 = vmatprep.subr.mxu1 %v1110_v61 }
 0x112   : > { %652 = vmatmul.mubr.f32.gmra.mxu0 %v367_v56  ;;  %1738 = vmatpush1.msra.mxu1 %v1109_v62 }
 0x113   : > { %807 = vmatmul.mubr.f32.gmra.mxu1 %v365_v54  ;;  %1202 = vmatpush1.msra.mxu0 %v1107_v0 }
 0x114   : > { %812 = vmatprep.mubr.f32.mxu1 %v368_v55  ;;  %1203 = vmatprep.subr.mxu0 %v1170_v1 }
 0x115   : > { %1204 = vmatpush2.msra.mxu0 %v1169_v2  ;;  %1707 = vmatprep.subr.mxu1 %v1108_v63 }
 0x116   : > { %1205 = vmatprep.subr.mxu0 %v1168_v3  ;;  %1739 = vmatpush1.msra.mxu1 %v1107_v0 }
 0x117   : > { %813 = vmatmul.mubr.f32.gmra.mxu1 %v367_v56  ;;  %1206 = vmatpush2.msra.mxu0 %v1167_v4 }
 0x118   : > { %1207 = vmatprep.subr.mxu0 %v1166_v5  ;;  %1708 = vmatprep.subr.mxu1 %v1170_v1 }
 0x119   : > { %1208 = vmatpush2.msra.mxu0 %v1165_v6  ;;  %1740 = vmatpush2.msra.mxu1 %v1169_v2 }
 0x11a   : > { %1209 = vmatprep.subr.mxu0 %v1164_v7  ;;  %1709 = vmatprep.subr.mxu1 %v1168_v3 }
 0x11b   : > { %1210 = vmatpush2.msra.mxu0 %v1163_v8  ;;  %1741 = vmatpush2.msra.mxu1 %v1167_v4 }
 0x11c   : > { %1211 = vmatprep.subr.mxu0 %v1162_v9  ;;  %1710 = vmatprep.subr.mxu1 %v1166_v5 }
 0x11d   : > { %1212 = vmatpush2.msra.mxu0 %v1161_v10  ;;  %1742 = vmatpush2.msra.mxu1 %v1165_v6 }
 0x11e   : > { %1213 = vmatprep.subr.mxu0 %v1160_v11  ;;  %1711 = vmatprep.subr.mxu1 %v1164_v7 }
 0x11f   : > { %1214 = vmatpush2.msra.mxu0 %v1159_v12  ;;  %1743 = vmatpush2.msra.mxu1 %v1163_v8 }
 0x120   : > { %1215 = vmatprep.subr.mxu0 %v1158_v13  ;;  %1712 = vmatprep.subr.mxu1 %v1162_v9 }
 0x121   : > { %1216 = vmatpush2.msra.mxu0 %v1157_v14  ;;  %1744 = vmatpush2.msra.mxu1 %v1161_v10 }
 0x122   : > { %1217 = vmatprep.subr.mxu0 %v1156_v15  ;;  %1713 = vmatprep.subr.mxu1 %v1160_v11 }
 0x123   : > { %1218 = vmatpush2.msra.mxu0 %v1155_v16  ;;  %1745 = vmatpush2.msra.mxu1 %v1159_v12 }
 0x124   : > { %1219 = vmatprep.subr.mxu0 %v1154_v17  ;;  %1714 = vmatprep.subr.mxu1 %v1158_v13 }
 0x125   : > { %1220 = vmatpush2.msra.mxu0 %v1153_v18  ;;  %1746 = vmatpush2.msra.mxu1 %v1157_v14 }
 0x126   : > { %1221 = vmatprep.subr.mxu0 %v1152_v19  ;;  %1715 = vmatprep.subr.mxu1 %v1156_v15 }
 0x127   : > { %1222 = vmatpush2.msra.mxu0 %v1151_v20  ;;  %1747 = vmatpush2.msra.mxu1 %v1155_v16 }
 0x128   : > { %1223 = vmatprep.subr.mxu0 %v1150_v21  ;;  %1716 = vmatprep.subr.mxu1 %v1154_v17 }
 0x129   : > { %1224 = vmatpush2.msra.mxu0 %v1149_v22  ;;  %1748 = vmatpush2.msra.mxu1 %v1153_v18 }
 0x12a   : > { %1225 = vmatprep.subr.mxu0 %v1148_v23  ;;  %1717 = vmatprep.subr.mxu1 %v1152_v19 }
 0x12b   : > { %1226 = vmatpush2.msra.mxu0 %v1147_v24  ;;  %1749 = vmatpush2.msra.mxu1 %v1151_v20 }
 0x12c   : > { %1227 = vmatprep.subr.mxu0 %v1146_v25  ;;  %1718 = vmatprep.subr.mxu1 %v1150_v21 }
 0x12d   : > { %1228 = vmatpush2.msra.mxu0 %v1145_v26  ;;  %1750 = vmatpush2.msra.mxu1 %v1149_v22 }
 0x12e   : > { %1229 = vmatprep.subr.mxu0 %v1144_v27  ;;  %1719 = vmatprep.subr.mxu1 %v1148_v23 }
 0x12f   : > { %1230 = vmatpush2.msra.mxu0 %v1143_v28  ;;  %1751 = vmatpush2.msra.mxu1 %v1147_v24 }
 0x130   : > { %1231 = vmatprep.subr.mxu0 %v1142_v29  ;;  %1720 = vmatprep.subr.mxu1 %v1146_v25 }
 0x131   : > { %1232 = vmatpush2.msra.mxu0 %v1141_v30  ;;  %1752 = vmatpush2.msra.mxu1 %v1145_v26 }
 0x132   : > { %1233 = vmatprep.subr.mxu0 %v1140_v31  ;;  %1721 = vmatprep.subr.mxu1 %v1144_v27 }
 0x133   : > { %1234 = vmatpush2.msra.mxu0 %v1139_v32  ;;  %1753 = vmatpush2.msra.mxu1 %v1143_v28 }
 0x134   : > { %1722 = vmatprep.subr.mxu1 %v1142_v29 }
 0x135   : > { %1754 = vmatpush2.msra.mxu1 %v1141_v30 }
 0x136   : > { %1723 = vmatprep.subr.mxu1 %v1140_v31 }
 0x137   : > { %1755 = vmatpush2.msra.mxu1 %v1139_v32 }
 0x196   : > { %v2684_v33 = vpop.f32.mrf.mxu0 }
 0x197   : > { %v1639_v34 = vmul.f32 -1.442695, %v2684_v33 }
 0x198   : > { %v2687_v35 = vpop.f32.mrf.mxu0 }
 0x199   : > { %1865 = vpow2.f32 %v1639_v34  ;;  %v1640_v36 = vmul.f32 -1.442695, %v2687_v35 }
 0x19a   : > { %v2690_v37 = vpop.f32.mrf.mxu0 }
 0x19b   : > { %1867 = vpow2.f32 %v1640_v36  ;;  %v1641_v38 = vmul.f32 -1.442695, %v2690_v37  ;;  %v2704_v46 = vpop.f32.mrf.mxu1 }
 0x19c   : > { %v2693_v39 = vpop.f32.mrf.mxu0 }
 0x19d   : > { %1869 = vpow2.f32 %v1641_v38  ;;  %v1642_v40 = vmul.f32 -1.442695, %v2693_v39  ;;  %v2709_v49 = vpop.f32.mrf.mxu1 }
 0x19e   : > { %v2696_v41 = vpop.f32.mrf.mxu0 }
 0x19f   : > { %1871 = vpow2.f32 %v1642_v40  ;;  %v1643_v42 = vmul.f32 -1.442695, %v2696_v41  ;;  %v2714_v53 = vpop.f32.mrf.mxu1 }
 0x1a0   : > { %v2699_v43 = vpop.f32.mrf.mxu0 }
 0x1a1   : > { %1873 = vpow2.f32 %v1643_v42  ;;  %v1644_v44 = vmul.f32 -1.442695, %v2699_v43  ;;  %v2719_v58 = vpop.f32.mrf.mxu1 }
 0x1a2   : > { %v2702_v45 = vpop.f32.mrf.mxu0 }
 0x1a3   : > { %1875 = vpow2.f32 %v1644_v44  ;;  %v1645_v47 = vmul.f32 -1.442695, %v2702_v45  ;;  %v2724_v63 = vpop.f32.mrf.mxu1 }
 0x1a4   : > { %v2707_v48 = vpop.f32.mrf.mxu0 }
 0x1a5   : > { %1877 = vpow2.f32 %v1645_v47  ;;  %v1646_v50 = vmul.f32 -1.442695, %v2707_v48  ;;  %v2729_v4 = vpop.f32.mrf.mxu1 }
 0x1a6   : > { %v1866_v51 = vpop.eup %1865  ;;  %v2712_v52 = vpop.f32.mrf.mxu0 }
 0x1a7   : > { %v915_v54 = vadd.f32 1.0, %v1866_v51  ;;  %1879 = vpow2.f32 %v1646_v50  ;;  %v1647_v55 = vmul.f32 -1.442695, %v2712_v52  ;;  %v2734_v9 = vpop.f32.mrf.mxu1 }
 0x1a8   : > { %v1868_v56 = vpop.eup %1867  ;;  %v2717_v57 = vpop.f32.mrf.mxu0 }
 0x1a9   : > { %1881 = vrcp.f32 %v915_v54  ;;  %v916_v59 = vadd.f32 1.0, %v1868_v56  ;;  %v1648_v60 = vmul.f32 -1.442695, %v2717_v57  ;;  %v2739_v14 = vpop.f32.mrf.mxu1 }
 0x1aa   : > { %v1870_v61 = vpop.eup %1869  ;;  %1883 = vpow2.f32 %v1647_v55  ;;  %v2722_v62 = vpop.f32.mrf.mxu0 }
 0x1ab   : > { %1885 = vrcp.f32 %v916_v59  ;;  %v917_v0 = vadd.f32 1.0, %v1870_v61  ;;  %v1649_v1 = vmul.f32 -1.442695, %v2722_v62  ;;  %v2744_v19 = vpop.f32.mrf.mxu1 }
 0x1ac   : > { %v1872_v2 = vpop.eup %1871  ;;  %1887 = vpow2.f32 %v1648_v60  ;;  %v2727_v3 = vpop.f32.mrf.mxu0 }
 0x1ad   : > { %1889 = vrcp.f32 %v917_v0  ;;  %v918_v5 = vadd.f32 1.0, %v1872_v2  ;;  %v1650_v6 = vmul.f32 -1.442695, %v2727_v3  ;;  %v2749_v24 = vpop.f32.mrf.mxu1 }
 0x1ae   : > { %v1874_v7 = vpop.eup %1873  ;;  %1891 = vpow2.f32 %v1649_v1  ;;  %v2732_v8 = vpop.f32.mrf.mxu0 }
 0x1af   : > { %1893 = vrcp.f32 %v918_v5  ;;  %v919_v10 = vadd.f32 1.0, %v1874_v7  ;;  %v1651_v11 = vmul.f32 -1.442695, %v2732_v8  ;;  %v2754_v29 = vpop.f32.mrf.mxu1 }
 0x1b0   : > { %v1876_v12 = vpop.eup %1875  ;;  %1895 = vpow2.f32 %v1650_v6  ;;  %v2737_v13 = vpop.f32.mrf.mxu0 }
 0x1b1   : > { %1897 = vrcp.f32 %v919_v10  ;;  %v920_v15 = vadd.f32 1.0, %v1876_v12  ;;  %v1652_v16 = vmul.f32 -1.442695, %v2737_v13  ;;  %v2760_v40 = vpop.f32.mrf.mxu1 }
 0x1b2   : > { %v1878_v17 = vpop.eup %1877  ;;  %1899 = vpow2.f32 %v1651_v11  ;;  %v2742_v18 = vpop.f32.mrf.mxu0 }
 0x1b3   : > { %1901 = vrcp.f32 %v920_v15  ;;  %v921_v20 = vadd.f32 1.0, %v1878_v17  ;;  %v1653_v21 = vmul.f32 -1.442695, %v2742_v18  ;;  %v2766_v55 = vpop.f32.mrf.mxu1 }
 0x1b4   : > { %v1880_v22 = vpop.eup %1879  ;;  %1903 = vpow2.f32 %v1652_v16  ;;  %v2747_v23 = vpop.f32.mrf.mxu0 }
 0x1b5   : > { %1905 = vrcp.f32 %v921_v20  ;;  %v922_v25 = vadd.f32 1.0, %v1880_v22  ;;  %v1654_v26 = vmul.f32 -1.442695, %v2747_v23  ;;  %v2774_v2 = vpop.f32.mrf.mxu1 }
 0x1b6   : > { %v1882_v27 = vpop.eup %1881  ;;  %1907 = vpow2.f32 %v1653_v21  ;;  %v2752_v28 = vpop.f32.mrf.mxu0 }
 0x1b7   : > { %v1884_v30 = vpop.eup %1883  ;;  %1909 = vrcp.f32 %v922_v25  ;;  %v1655_v31 = vmul.f32 -1.442695, %v2752_v28  ;;  %v1011_v34 = vmul.f32 %v1882_v27, %v2684_v33 }
 0x1b8   : > { %v1886_v32 = vpop.eup %1885  ;;  %v923_v36 = vadd.f32 1.0, %v1884_v30  ;;  %1911 = vpow2.f32 %v1654_v26  ;;  %v2758_v38 = vpop.f32.mrf.mxu0 }
 0x1b9   : > { %v1888_v42 = vpop.eup %1887  ;;  %v1012_v44 = vmul.f32 %v1886_v32, %v2687_v35  ;;  %1913 = vpow2.f32 %v1655_v31  ;;  %v1656_v47 = vmul.f32 -1.442695, %v2758_v38  ;;  %v1043_v0 = vmul.f32 %v1011_v34, %v2704_v46 }
 0x1ba   : > { %v1890_v50 = vpop.eup %1889  ;;  %1915 = vrcp.f32 %v923_v36  ;;  %v924_v51 = vadd.f32 1.0, %v1888_v42  ;;  %v2764_v54 = vpop.f32.mrf.mxu0 }
 0x1bb   : > { %v1892_v33 = vpop.eup %1891  ;;  %1917 = vpow2.f32 %v1656_v47  ;;  %v1044_v56 = vmul.f32 %v1012_v44, %v2709_v49  ;;  %v1657_v59 = vmul.f32 -1.442695, %v2764_v54  ;;  %v1013_v61 = vmul.f32 %v1890_v50, %v2690_v37  ;;  %v2780_v37 = vpop.f32.mrf.mxu1 }
 0x1bc   : > { %v1894_v60 = vpop.eup %1893  ;;  %1919 = vrcp.f32 %v924_v51  ;;  %v925_v35 = vadd.f32 1.0, %v1892_v33  ;;  %v2772_v1 = vpop.f32.mrf.mxu0 }
 0x1bd   : > { %v1896_v5 = vpop.eup %1895  ;;  %v1014_v6 = vmul.f32 %v1894_v60, %v2693_v39  ;;  %1921 = vpow2.f32 %v1657_v59  ;;  %v1658_v7 = vmul.f32 -1.442695, %v2772_v1  ;;  %1235 = vmatprep.mubr.f32.mxu0 %v1044_v56  ;;  %v1045_v20 = vmul.f32 %v1013_v61, %v2714_v53  ;;  %v2788_v22 = vpop.f32.mrf.mxu1 }
 0x1be   : > { %v1898_v49 = vpop.eup %1897  ;;  %1923 = vrcp.f32 %v925_v35  ;;  %v926_v10 = vadd.f32 1.0, %v1896_v5  ;;  %v2778_v11 = vpop.f32.mrf.mxu0  ;;  %1236 = vmatmul.mubr.f32.vlgmr.msra.gmra.mxu0 %v1043_v0 }
 0x1bf   : > { %v1900_v46 = vpop.eup %1899  ;;  %1925 = vpow2.f32 %v1658_v7  ;;  %v1046_v12 = vmul.f32 %v1014_v6, %v2719_v58  ;;  %v1659_v15 = vmul.f32 -1.442695, %v2778_v11  ;;  %v1015_v39 = vmul.f32 %v1898_v49, %v2696_v41  ;;  %v2794_v41 = vpop.f32.mrf.mxu1 }
 0x1c0   : > { %v1902_v16 = vpop.eup %1901  ;;  %1927 = vrcp.f32 %v926_v10  ;;  %v927_v17 = vadd.f32 1.0, %v1900_v46  ;;  %v2786_v21 = vpop.f32.mrf.mxu0 }
 0x1c1   : > { %v1904_v25 = vpop.eup %1903  ;;  %v1016_v26 = vmul.f32 %v1902_v16, %v2699_v43  ;;  %1929 = vpow2.f32 %v1659_v15  ;;  %v1660_v27 = vmul.f32 -1.442695, %v2786_v21  ;;  %1241 = vmatprep.mubr.f32.mxu0 %v1046_v12  ;;  %v1047_v44 = vmul.f32 %v1015_v39, %v2724_v63  ;;  %v2802_v50 = vpop.f32.mrf.mxu1 }
 0x1c2   : > { %v1906_v58 = vpop.eup %1905  ;;  %1931 = vrcp.f32 %v927_v17  ;;  %v928_v30 = vadd.f32 1.0, %v1904_v25  ;;  %v2792_v31 = vpop.f32.mrf.mxu0  ;;  %1242 = vmatmul.mubr.f32.gmra.mxu0 %v1045_v20 }
 0x1c3   : > { %v1908_v53 = vpop.eup %1907  ;;  %1933 = vpow2.f32 %v1660_v27  ;;  %v1048_v32 = vmul.f32 %v1016_v26, %v2729_v4  ;;  %v1661_v34 = vmul.f32 -1.442695, %v2792_v31  ;;  %v1017_v43 = vmul.f32 %v1906_v58, %v2702_v45  ;;  %v2808_v45 = vpop.f32.mrf.mxu1 }
 0x1c4   : > { %v1910_v36 = vpop.eup %1909  ;;  %1935 = vrcp.f32 %v928_v30  ;;  %v929_v42 = vadd.f32 1.0, %v1908_v53  ;;  %v2800_v47 = vpop.f32.mrf.mxu0 }
 0x1c5   : > { %v1912_v51 = vpop.eup %1911  ;;  %v1018_v33 = vmul.f32 %v1910_v36, %v2707_v48  ;;  %1937 = vpow2.f32 %v1661_v34  ;;  %v1662_v56 = vmul.f32 -1.442695, %v2800_v47  ;;  %1247 = vmatprep.mubr.f32.mxu0 %v1048_v32  ;;  %v1049_v6 = vmul.f32 %v1017_v43, %v2734_v9  ;;  %v2816_v49 = vpop.f32.mrf.mxu1 }
 0x1c6   : > { %v1914_v4 = vpop.eup %1913  ;;  %1939 = vrcp.f32 %v929_v42  ;;  %v930_v59 = vadd.f32 1.0, %v1912_v51  ;;  %v2806_v60 = vpop.f32.mrf.mxu0  ;;  %1248 = vmatmul.mubr.f32.gmra.mxu0 %v1047_v44 }
 0x1c7   : > { %v1916_v63 = vpop.eup %1915  ;;  %v931_v61 = vadd.f32 1.0, %v1914_v4  ;;  %1941 = vpow2.f32 %v1662_v56  ;;  %v1050_v35 = vmul.f32 %v1018_v33, %v2739_v14  ;;  %v1663_v0 = vmul.f32 -1.442695, %v2806_v60  ;;  %v2823_v17 = vpop.f32.mrf.mxu1 }
 0x1c8   : > { %v1918_v48 = vpop.eup %1917  ;;  %v1019_v5 = vmul.f32 %v1916_v63, %v2712_v52  ;;  %1943 = vrcp.f32 %v930_v59  ;;  %v2814_v7 = vpop.f32.mrf.mxu0 }
 0x1c9   : > { %v1920_v10 = vpop.eup %1919  ;;  %1945 = vrcp.f32 %v931_v61  ;;  %v932_v46 = vadd.f32 1.0, %v1918_v48  ;;  %v1664_v12 = vmul.f32 -1.442695, %v2814_v7  ;;  %1253 = vmatprep.mubr.f32.mxu0 %v1050_v35  ;;  %v2835_v42 = vpop.f32.mrf.mxu1 }
 0x1ca   : > { %v1922_v15 = vpop.eup %1921  ;;  %v1020_v14 = vmul.f32 %v1920_v10, %v2717_v57  ;;  %1947 = vpow2.f32 %v1663_v0  ;;  %v2820_v16 = vpop.f32.mrf.mxu0  ;;  %1254 = vmatmul.mubr.f32.gmra.mxu0 %v1049_v6  ;;  %v1051_v25 = vmul.f32 %v1019_v5, %v2744_v19 }
 0x1cb   : > { %v1924_v52 = vpop.eup %1923  ;;  %1949 = vrcp.f32 %v932_v46  ;;  %v933_v9 = vadd.f32 1.0, %v1922_v15  ;;  %v1665_v39 = vmul.f32 -1.442695, %v2820_v16  ;;  %v2847_v48 = vpop.f32.mrf.mxu1 }
 0x1cc   : > { %v1926_v20 = vpop.eup %1925  ;;  %1951 = vpow2.f32 %v1664_v12  ;;  %v1052_v26 = vmul.f32 %v1020_v14, %v2749_v24  ;;  %v2827_v27 = vpop.f32.mrf.mxu0  ;;  %v1021_v58 = vmul.f32 %v1924_v52, %v2722_v62 }
 0x1cd   : > { %v1928_v57 = vpop.eup %1927  ;;  %1953 = vrcp.f32 %v933_v9  ;;  %v934_v30 = vadd.f32 1.0, %v1926_v20  ;;  %v1666_v53 = vmul.f32 -1.442695, %v2827_v27 }
 0x1ce   : > { %v1930_v32 = vpop.eup %1929  ;;  %v1022_v34 = vmul.f32 %v1928_v57, %v2727_v3  ;;  %1955 = vpow2.f32 %v1665_v39  ;;  %1259 = vmatprep.mubr.f32.mxu0 %v1052_v26  ;;  %v2832_v36 = vpop.f32.mrf.mxu0  ;;  %v1053_v4 = vmul.f32 %v1021_v58, %v2754_v29 }
 0x1cf   : > { %v1932_v19 = vpop.eup %1931  ;;  %1957 = vrcp.f32 %v934_v30  ;;  %v935_v43 = vadd.f32 1.0, %v1930_v32  ;;  %v1667_v24 = vmul.f32 -1.442695, %v2832_v36  ;;  %1260 = vmatmul.mubr.f32.gmra.mxu0 %v1051_v25 }
 0x1d0   : > { %v1934_v62 = vpop.eup %1933  ;;  %v1023_v44 = vmul.f32 %v1932_v19, %v2732_v8  ;;  %1959 = vpow2.f32 %v1666_v53  ;;  %v1054_v51 = vmul.f32 %v1022_v34, %v2760_v40  ;;  %v2839_v33 = vpop.f32.mrf.mxu0 }
 0x1d1   : > { %v1936_v3 = vpop.eup %1935  ;;  %1961 = vrcp.f32 %v935_v43  ;;  %v936_v56 = vadd.f32 1.0, %v1934_v62  ;;  %v1668_v59 = vmul.f32 -1.442695, %v2839_v33 }
 0x1d2   : > { %v1938_v63 = vpop.eup %1937  ;;  %v1024_v61 = vmul.f32 %v1936_v3, %v2737_v13  ;;  %1963 = vpow2.f32 %v1667_v24  ;;  %1265 = vmatprep.mubr.f32.mxu0 %v1054_v51  ;;  %v2844_v35 = vpop.f32.mrf.mxu0  ;;  %v1055_v29 = vmul.f32 %v1023_v44, %v2766_v55 }
 0x1d3   : > { %v1940_v8 = vpop.eup %1939  ;;  %1965 = vrcp.f32 %v936_v56  ;;  %v937_v0 = vadd.f32 1.0, %v1938_v63  ;;  %v1669_v40 = vmul.f32 -1.442695, %v2844_v35  ;;  %1266 = vmatmul.mubr.f32.gmra.mxu0 %v1053_v4  ;;  %v792_v55 = vpop.f32.mrf.mxu1 }
 0x1d4   : > { %v1942_v5 = vpop.eup %1941  ;;  %1967 = vpow2.f32 %v1668_v59  ;;  %v1056_v6 = vmul.f32 %v1024_v61, %v2774_v2  ;;  %v2851_v10 = vpop.f32.mrf.mxu0  ;;  %v1025_v46 = vmul.f32 %v1940_v8, %v2742_v18 }
 0x1d5   : > { %v1944_v13 = vpop.eup %1943  ;;  %1969 = vrcp.f32 %v937_v0  ;;  %v938_v12 = vadd.f32 1.0, %v1942_v5  ;;  %v1670_v15 = vmul.f32 -1.442695, %v2851_v10  ;;  %v796_v32 = vpop.f32.mrf.mxu1 }
 0x1d6   : > { %v1946_v14 = vpop.eup %1945  ;;  %v1026_v52 = vmul.f32 %v1944_v13, %v2747_v23  ;;  %1971 = vpow2.f32 %v1669_v40  ;;  %1271 = vmatprep.mubr.f32.mxu0 %v1056_v6  ;;  %v1057_v57 = vmul.f32 %v1025_v46, %v2780_v37 }
 0x1d7   : > { %v1948_v9 = vpop.eup %1947  ;;  %1973 = vrcp.f32 %v938_v12  ;;  %1272 = vmatmul.mubr.f32.gmra.mxu0 %v1055_v29  ;;  %v1027_v2 = vmul.f32 %v1946_v14, %v2752_v28  ;;  %v798_v44 = vpop.f32.mrf.mxu1 }
 0x1d8   : > { %v1950_v39 = vpop.eup %1949  ;;  %v939_v20 = vadd.f32 1.0, %v1948_v9  ;;  %1975 = vpow2.f32 %v1670_v15  ;;  %v1058_v18 = vmul.f32 %v1026_v52, %v2788_v22 }
 0x1d9   : > { %v1952_v25 = vpop.eup %1951  ;;  %v1028_v26 = vmul.f32 %v1950_v39, %v2758_v38  ;;  %v1059_v22 = vmul.f32 %v1027_v2, %v2794_v41 }
 0x1da   : > { %v1954_v58 = vpop.eup %1953  ;;  %1977 = vrcp.f32 %v939_v20  ;;  %v940_v23 = vadd.f32 1.0, %v1952_v25  ;;  %1277 = vmatprep.mubr.f32.mxu0 %v1058_v18 }
 0x1db   : > { %v1956_v30 = vpop.eup %1955  ;;  %v1060_v53 = vmul.f32 %v1028_v26, %v2802_v50  ;;  %1278 = vmatmul.mubr.f32.gmra.mxu0 %v1057_v57  ;;  %v1029_v28 = vmul.f32 %v1954_v58, %v2764_v54 }
 0x1dc   : > { %v1958_v34 = vpop.eup %1957  ;;  %1979 = vrcp.f32 %v940_v23  ;;  %v941_v19 = vadd.f32 1.0, %v1956_v30 }
 0x1dd   : > { %v1960_v43 = vpop.eup %1959  ;;  %v1030_v38 = vmul.f32 %v1958_v34, %v2772_v1  ;;  %1283 = vmatprep.mubr.f32.mxu1 %v1060_v53  ;;  %v1061_v56 = vmul.f32 %v1029_v28, %v2808_v45  ;;  %v1076_v34 = vld [vmem:[#allocation2] sm:$0xff] }
 0x1de   : > { %v1962_v37 = vpop.eup %1961  ;;  %1981 = vrcp.f32 %v941_v19  ;;  %v942_v24 = vadd.f32 1.0, %v1960_v43  ;;  %1284 = vmatmul.mubr.f32.vlgmr.msra.gmra.mxu1 %v1059_v22  ;;  %v1077_v22 = vld [vmem:[#allocation2 + $0xd8] sm:$0xff] }
 0x1df   : > { %v1964_v62 = vpop.eup %1963  ;;  %v1062_v50 = vmul.f32 %v1030_v38, %v2816_v49  ;;  %v1031_v3 = vmul.f32 %v1962_v37, %v2778_v11  ;;  %v802_v49 = vpop.f32.mrf.mxu1 }
 0x1e0   : > { %v1966_v51 = vpop.eup %1965  ;;  %1983 = vrcp.f32 %v942_v24  ;;  %v943_v54 = vadd.f32 1.0, %v1964_v62  ;;  %v1079_v24 = vld [vmem:[#allocation2 + $0x50] sm:$0xff] }
 0x1e1   : > { %v1968_v41 = vpop.eup %1967  ;;  %v1032_v4 = vmul.f32 %v1966_v51, %v2786_v21  ;;  %1289 = vmatprep.mubr.f32.mxu1 %v1062_v50  ;;  %v1063_v40 = vmul.f32 %v1031_v3, %v2823_v17  ;;  %v804_v13 = vpop.f32.mrf.mxu1 }
 0x1e2   : > { %v1970_v1 = vpop.eup %1969  ;;  %1985 = vrcp.f32 %v943_v54  ;;  %v944_v59 = vadd.f32 1.0, %v1968_v41  ;;  %1290 = vmatmul.mubr.f32.gmra.mxu1 %v1061_v56  ;;  %v1081_v54 = vld [vmem:[#allocation2 + $0x30] sm:$0xff] }
 0x1e3   : > { %v1972_v63 = vpop.eup %1971  ;;  %v1064_v61 = vmul.f32 %v1032_v4, %v2835_v42  ;;  %v1033_v0 = vmul.f32 %v1970_v1, %v2792_v31  ;;  %v808_v15 = vpop.f32.mrf.mxu1  ;;  %v1082_v4 = vld [vmem:[#allocation2 + $0x48] sm:$0xff] }
 0x1e4   : > { %v1974_v8 = vpop.eup %1973  ;;  %1987 = vrcp.f32 %v944_v59  ;;  %v945_v11 = vadd.f32 1.0, %v1972_v63 }
 0x1e5   : > { %v1976_v45 = vpop.eup %1975  ;;  %v1034_v5 = vmul.f32 %v1974_v8, %v2800_v47  ;;  %1295 = vmatprep.mubr.f32.mxu1 %v1064_v61  ;;  %v1065_v42 = vmul.f32 %v1033_v0, %v2847_v48  ;;  %v810_v48 = vpop.f32.mrf.mxu1  ;;  %v1083_v61 = vld [vmem:[#allocation2 + $0x80] sm:$0xff]  ;;  %v1084_v8 = vld [vmem:[#allocation2 + $0x88] sm:$0xff] }
 0x1e6   : > { %1989 = vrcp.f32 %v945_v11  ;;  %v946_v21 = vadd.f32 1.0, %v1976_v45  ;;  %1296 = vmatmul.mubr.f32.gmra.mxu1 %v1063_v40  ;;  %v1085_v40 = vld [vmem:[#allocation2 + $0xe8] sm:$0xff] }
 0x1e7   : > { %v1978_v29 = vpop.eup %1977  ;;  %v1066_v6 = vmul.f32 %v1034_v5, %v792_v55  ;;  %v814_v26 = vpop.f32.mrf.mxu1 }
 0x1e8   : > { %1991 = vrcp.f32 %v946_v21  ;;  %v1035_v31 = vmul.f32 %v1978_v29, %v2806_v60  ;;  %v1086_v21 = vld [vmem:[#allocation2 + $0xb8] sm:$0xff] }
 0x1e9   : > { %v1980_v46 = vpop.eup %1979  ;;  %1301 = vmatprep.mubr.f32.mxu1 %v1066_v6  ;;  %v816_v30 = vpop.f32.mrf.mxu1 }
 0x1ea   : > { %v1036_v12 = vmul.f32 %v1980_v46, %v2814_v7  ;;  %1302 = vmatmul.mubr.f32.gmra.mxu1 %v1065_v42  ;;  %v1067_v9 = vmul.f32 %v1035_v31, %v796_v32  ;;  %v1088_v31 = vld [vmem:[#allocation2 + $0xf0] sm:$0xff] }
 0x1eb   : > { %v1982_v17 = vpop.eup %1981 }
 0x1ec   : > { %v1068_v47 = vmul.f32 %v1036_v12, %v798_v44  ;;  %v1037_v52 = vmul.f32 %v1982_v17, %v2820_v16  ;;  %v1080_v44 = vld [vmem:[#allocation2 + $0x68] sm:$0xff] }
 0x1ed   : > { %v1984_v14 = vpop.eup %1983 }
 0x1ee   : > { %v1038_v55 = vmul.f32 %v1984_v14, %v2827_v27  ;;  %1307 = vmatprep.mubr.f32.mxu1 %v1068_v47  ;;  %v1069_v18 = vmul.f32 %v1037_v52, %v802_v49  ;;  %v1090_v52 = vld [vmem:[#allocation2 + $0x78] sm:$0xff] }
 0x1ef   : > { %v1986_v39 = vpop.eup %1985  ;;  %1308 = vmatmul.mubr.f32.gmra.mxu1 %v1067_v9 }
 0x1f0   : > { %v1070_v2 = vmul.f32 %v1038_v55, %v804_v13  ;;  %v1039_v60 = vmul.f32 %v1986_v39, %v2832_v36  ;;  %v1075_v36 = vld [vmem:[#allocation2 + $0xb0] sm:$0xff]  ;;  %v1087_v13 = vld [vmem:[#allocation2 + $0x60] sm:$0xff]  ;;  %v1091_v55 = vld [vmem:[#allocation2 + $0x38] sm:$0xff] }
 0x1f1   : > { %v1988_v20 = vpop.eup %1987 }
 0x1f2   : > { %v1040_v7 = vmul.f32 %v1988_v20, %v2839_v33  ;;  %1313 = vmatprep.mubr.f32.mxu1 %v1070_v2  ;;  %v1071_v27 = vmul.f32 %v1039_v60, %v808_v15  ;;  %v1089_v15 = vld [vmem:[#allocation2 + $0x8] sm:$0xff]  ;;  %v1092_v20 = vld [vmem:[#allocation2 + $0x58] sm:$0xff] }
 0x1f3   : > { %v1990_v25 = vpop.eup %1989  ;;  %1314 = vmatmul.mubr.f32.gmra.mxu1 %v1069_v18 }
 0x1f4   : > { %v1072_v57 = vmul.f32 %v1040_v7, %v810_v48  ;;  %v1041_v58 = vmul.f32 %v1990_v25, %v2844_v35  ;;  %v1078_v35 = vld [vmem:[#allocation2 + $0x18] sm:$0xff]  ;;  %v1093_v7 = vld [vmem:[#allocation2 + $0x40] sm:$0xff] }
 0x1f5   : > { %v1992_v16 = vpop.eup %1991 }
 0x1f6   : > { %v1042_v23 = vmul.f32 %v1992_v16, %v2851_v10  ;;  %1319 = vmatprep.mubr.f32.mxu1 %v1072_v57  ;;  %v1073_v32 = vmul.f32 %v1041_v58, %v814_v26  ;;  %v1094_v57 = vld [vmem:[#allocation2 + $0xc8] sm:$0xff] }
 0x1f7   : > { %1320 = vmatmul.mubr.f32.gmra.mxu1 %v1071_v27  ;;  %v1095_v27 = vld [vmem:[#allocation2 + $0xe0] sm:$0xff] }
 0x1f8   : > { %v1074_v53 = vmul.f32 %v1042_v23, %v816_v30 }
 0x1fa   : > { %1325 = vmatprep.mubr.f32.mxu1 %v1074_v53  ;;  %v1096_v53 = vld [vmem:[#allocation2 + $0x90] sm:$0xff] }
 0x1fb   : > { %1326 = vmatmul.mubr.f32.gmra.mxu1 %v1073_v32 }
 0x27e   : > { %v1237_v33 = vpop.f32.mrf.mxu0 }
 0x27f   : > { %v1332_v28 = vadd.f32 %v1237_v33, %v1075_v36  ;;  %v1097_v33 = vld [vmem:[#allocation2 + $0x70] sm:$0xff] }
 0x280   : > { %v1239_v19 = vpop.f32.mrf.mxu0 }
 0x281   : > { %1364 = vst [vmem:[#allocation2 + $0xb0] sm:$0xff] %v1332_v28  ;;  %v1333_v43 = vadd.f32 %v1239_v19, %v1076_v34  ;;  %v1098_v19 = vld [vmem:[#allocation2 + $0xc0] sm:$0xff] }
 0x282   : > { %v1243_v38 = vpop.f32.mrf.mxu0 }
 0x283   : > { %1365 = vst [vmem:[#allocation2] sm:$0xff] %v1333_v43  ;;  %v1334_v37 = vadd.f32 %v1243_v38, %v1077_v22 }
 0x284   : > { %v1245_v10 = vpop.f32.mrf.mxu0 }
 0x285   : > { %1366 = vst [vmem:[#allocation2 + $0xd8] sm:$0xff] %v1334_v37  ;;  %v1335_v62 = vadd.f32 %v1245_v10, %v1078_v35  ;;  %v1099_v35 = vld [vmem:[#allocation2 + $0xa8] sm:$0xff]  ;;  %v1100_v10 = vld [vmem:[#allocation2 + $0xd0] sm:$0xff] }
 0x286   : > { %v1249_v50 = vpop.f32.mrf.mxu0 }
 0x287   : > { %1367 = vst [vmem:[#allocation2 + $0x18] sm:$0xff] %v1335_v62  ;;  %v1336_v51 = vadd.f32 %v1249_v50, %v1079_v24  ;;  %v1101_v50 = vld [vmem:[#allocation2 + $0x10] sm:$0xff] }
 0x288   : > { %v1251_v3 = vpop.f32.mrf.mxu0 }
 0x289   : > { %1368 = vst [vmem:[#allocation2 + $0x50] sm:$0xff] %v1336_v51  ;;  %v1337_v56 = vadd.f32 %v1251_v3, %v1080_v44  ;;  %v1102_v3 = vld [vmem:[#allocation2 + $0x28] sm:$0xff] }
 0x28a   : > { %v1255_v41 = vpop.f32.mrf.mxu0 }
 0x28b   : > { %1369 = vst [vmem:[#allocation2 + $0x68] sm:$0xff] %v1337_v56  ;;  %v1338_v1 = vadd.f32 %v1255_v41, %v1081_v54  ;;  %v1103_v41 = vld [vmem:[#allocation2 + $0xa0] sm:$0xff] }
 0x28c   : > { %v1257_v59 = vpop.f32.mrf.mxu0 }
 0x28d   : > { %1370 = vst [vmem:[#allocation2 + $0x30] sm:$0xff] %v1338_v1  ;;  %v1339_v63 = vadd.f32 %v1257_v59, %v1082_v4  ;;  %v1104_v59 = vld [vmem:[#allocation2 + $0xf8] sm:$0xff] }
 0x28f   : > { %1371 = vst [vmem:[#allocation2 + $0x48] sm:$0xff] %v1339_v63  ;;  %v1261_v49 = vpop.f32.mrf.mxu0 }
 0x290   : > { %v1340_v0 = vadd.f32 %v1261_v49, %v1083_v61  ;;  %v1105_v49 = vld [vmem:[#allocation2 + $0x20] sm:$0xff] }
 0x291   : > { %v1263_v11 = vpop.f32.mrf.mxu0 }
 0x292   : > { %1372 = vst [vmem:[#allocation2 + $0x80] sm:$0xff] %v1340_v0  ;;  %v1341_v45 = vadd.f32 %v1263_v11, %v1084_v8  ;;  %v1106_v11 = vld [vmem:[#allocation2 + $0x98] sm:$0xff] }
 0x293   : > { %v1267_v5 = vpop.f32.mrf.mxu0 }
 0x294   : > { %1373 = vst [vmem:[#allocation2 + $0x88] sm:$0xff] %v1341_v45  ;;  %v1342_v29 = vadd.f32 %v1267_v5, %v1085_v40 }
 0x295   : > { %v1269_v6 = vpop.f32.mrf.mxu0 }
 0x296   : > { %1374 = vst [vmem:[#allocation2 + $0xe8] sm:$0xff] %v1342_v29  ;;  %v1343_v42 = vadd.f32 %v1269_v6, %v1086_v21 }
 0x297   : > { %v1273_v46 = vpop.f32.mrf.mxu0 }
 0x298   : > { %1375 = vst [vmem:[#allocation2 + $0xb8] sm:$0xff] %v1343_v42  ;;  %v1344_v12 = vadd.f32 %v1273_v46, %v1087_v13 }
 0x299   : > { %v1275_v17 = vpop.f32.mrf.mxu0 }
 0x29a   : > { %1376 = vst [vmem:[#allocation2 + $0x60] sm:$0xff] %v1344_v12  ;;  %v1345_v47 = vadd.f32 %v1275_v17, %v1088_v31 }
 0x29b   : > { %v1279_v14 = vpop.f32.mrf.mxu0 }
 0x29c   : > { %1377 = vst [vmem:[#allocation2 + $0xf0] sm:$0xff] %v1345_v47  ;;  %v1346_v9 = vadd.f32 %v1279_v14, %v1089_v15 }
 0x29d   : > { %v1281_v39 = vpop.f32.mrf.mxu0 }
 0x29e   : > { %1378 = vst [vmem:[#allocation2 + $0x8] sm:$0xff] %v1346_v9  ;;  %v1347_v48 = vadd.f32 %v1281_v39, %v1090_v52  ;;  %v1285_v2 = vpop.f32.mrf.mxu1 }
 0x29f   : > { %v1348_v60 = vadd.f32 %v1285_v2, %v1091_v55 }
 0x2a0   : > { %1379 = vst [vmem:[#allocation2 + $0x78] sm:$0xff] %v1347_v48  ;;  %v1287_v18 = vpop.f32.mrf.mxu1 }
 0x2a1   : > { %1380 = vst [vmem:[#allocation2 + $0x38] sm:$0xff] %v1348_v60  ;;  %v1349_v25 = vadd.f32 %v1287_v18, %v1092_v20 }
 0x2a2   : > { %v1291_v26 = vpop.f32.mrf.mxu1 }
 0x2a3   : > { %1381 = vst [vmem:[#allocation2 + $0x58] sm:$0xff] %v1349_v25  ;;  %v1350_v16 = vadd.f32 %v1291_v26, %v1093_v7 }
 0x2a4   : > { %v1293_v58 = vpop.f32.mrf.mxu1 }
 0x2a5   : > { %1382 = vst [vmem:[#allocation2 + $0x40] sm:$0xff] %v1350_v16  ;;  %v1351_v23 = vadd.f32 %v1293_v58, %v1094_v57 }
 0x2a6   : > { %v1297_v30 = vpop.f32.mrf.mxu1 }
 0x2a7   : > { %1383 = vst [vmem:[#allocation2 + $0xc8] sm:$0xff] %v1351_v23  ;;  %v1352_v32 = vadd.f32 %v1297_v30, %v1095_v27 }
 0x2a8   : > { %v1299_v36 = vpop.f32.mrf.mxu1 }
 0x2a9   : > { %1384 = vst [vmem:[#allocation2 + $0xe0] sm:$0xff] %v1352_v32  ;;  %v1353_v34 = vadd.f32 %v1299_v36, %v1096_v53 }
 0x2aa   : > { %v1303_v28 = vpop.f32.mrf.mxu1 }
 0x2ab   : > { %1385 = vst [vmem:[#allocation2 + $0x90] sm:$0xff] %v1353_v34  ;;  %v1354_v22 = vadd.f32 %v1303_v28, %v1097_v33 }
 0x2ac   : > { %v1305_v43 = vpop.f32.mrf.mxu1 }
 0x2ad   : > { %1386 = vst [vmem:[#allocation2 + $0x70] sm:$0xff] %v1354_v22  ;;  %v1355_v38 = vadd.f32 %v1305_v43, %v1098_v19 }
 0x2af   : > { %1387 = vst [vmem:[#allocation2 + $0xc0] sm:$0xff] %v1355_v38  ;;  %v1309_v37 = vpop.f32.mrf.mxu1 }
 0x2b0   : > { %v1356_v24 = vadd.f32 %v1309_v37, %v1099_v35 }
 0x2b1   : > { %v1311_v62 = vpop.f32.mrf.mxu1 }
 0x2b2   : > { %1388 = vst [vmem:[#allocation2 + $0xa8] sm:$0xff] %v1356_v24  ;;  %v1357_v44 = vadd.f32 %v1311_v62, %v1100_v10 }
 0x2b3   : > { %v1315_v51 = vpop.f32.mrf.mxu1 }
 0x2b4   : > { %1389 = vst [vmem:[#allocation2 + $0xd0] sm:$0xff] %v1357_v44  ;;  %v1358_v54 = vadd.f32 %v1315_v51, %v1101_v50 }
 0x2b5   : > { %v1317_v56 = vpop.f32.mrf.mxu1 }
 0x2b6   : > { %1390 = vst [vmem:[#allocation2 + $0x10] sm:$0xff] %v1358_v54  ;;  %v1359_v4 = vadd.f32 %v1317_v56, %v1102_v3 }
 0x2b7   : > { %v1321_v1 = vpop.f32.mrf.mxu1 }
 0x2b8   : > { %1391 = vst [vmem:[#allocation2 + $0x28] sm:$0xff] %v1359_v4  ;;  %v1360_v63 = vadd.f32 %v1321_v1, %v1103_v41 }
 0x2b9   : > { %v1323_v61 = vpop.f32.mrf.mxu1 }
 0x2ba   : > { %1392 = vst [vmem:[#allocation2 + $0xa0] sm:$0xff] %v1360_v63  ;;  %v1361_v8 = vadd.f32 %v1323_v61, %v1104_v59 }
 0x2bb   : > { %v1327_v0 = vpop.f32.mrf.mxu1 }
 0x2bc   : > { %1393 = vst [vmem:[#allocation2 + $0xf8] sm:$0xff] %v1361_v8  ;;  %v1362_v40 = vadd.f32 %v1327_v0, %v1105_v49  ;;  %1399 = sbr.rel (%p1671_p12) target bundleno = 722 (0x2d2), region = 52 }
 0x2bd   : > { %v1329_v45 = vpop.f32.mrf.mxu1 }
 0x2be   : > { %1394 = vst [vmem:[#allocation2 + $0x20] sm:$0xff] %v1362_v40  ;;  %v1363_v5 = vadd.f32 %v1329_v45, %v1106_v11 }
 0x2c0   : > { %1395 = vst [vmem:[#allocation2 + $0x98] sm:$0xff] %v1363_v5 }
 0x2c1   : > { %v1400_v21 = vld [vmem:[#allocation2 + $0xb0] sm:$0xff]  ;;  %v1401_v29 = vld [vmem:[#allocation2] sm:$0xff]  ;;  %v1402_v6 = vld [vmem:[#allocation2 + $0xd8] sm:$0xff] }
 0x2c2   : > { %1432 = vst [vmem:[%s2453_s7] sm:$0xff] %v1400_v21  ;;  %1433 = vst [vmem:[%s2453_s7 + $0x8] sm:$0xff] %v1401_v29  ;;  %v1403_v13 = vld [vmem:[#allocation2 + $0x18] sm:$0xff]  ;;  %v1404_v42 = vld [vmem:[#allocation2 + $0x50] sm:$0xff] }
 0x2c3   : > { %1434 = vst [vmem:[%s2453_s7 + $0x10] sm:$0xff] %v1402_v6  ;;  %v1405_v46 = vld [vmem:[#allocation2 + $0x68] sm:$0xff]  ;;  %1435 = vst [vmem:[%s2453_s7 + $0x18] sm:$0xff] %v1403_v13  ;;  %v1406_v31 = vld [vmem:[#allocation2 + $0x30] sm:$0xff] }
 0x2c4   : > { %1436 = vst [vmem:[%s2453_s7 + $0x20] sm:$0xff] %v1404_v42  ;;  %1437 = vst [vmem:[%s2453_s7 + $0x28] sm:$0xff] %v1405_v46  ;;  %v1407_v12 = vld [vmem:[#allocation2 + $0x48] sm:$0xff]  ;;  %v1408_v17 = vld [vmem:[#allocation2 + $0x80] sm:$0xff] }
 0x2c5   : > { %1438 = vst [vmem:[%s2453_s7 + $0x30] sm:$0xff] %v1406_v31  ;;  %1439 = vst [vmem:[%s2453_s7 + $0x38] sm:$0xff] %v1407_v12  ;;  %v1409_v15 = vld [vmem:[#allocation2 + $0x88] sm:$0xff]  ;;  %v1411_v14 = vld [vmem:[#allocation2 + $0xb8] sm:$0xff] }
 0x2c6   : > { %1440 = vst [vmem:[%s2453_s7 + $0x40] sm:$0xff] %v1408_v17  ;;  %v1410_v47 = vld [vmem:[#allocation2 + $0xe8] sm:$0xff]  ;;  %1441 = vst [vmem:[%s2453_s7 + $0x48] sm:$0xff] %v1409_v15  ;;  %v1412_v52 = vld [vmem:[#allocation2 + $0x60] sm:$0xff] }
 0x2c7   : > { %1442 = vst [vmem:[%s2453_s7 + $0x50] sm:$0xff] %v1410_v47  ;;  %1443 = vst [vmem:[%s2453_s7 + $0x58] sm:$0xff] %v1411_v14  ;;  %v1413_v9 = vld [vmem:[#allocation2 + $0xf0] sm:$0xff]  ;;  %v1414_v55 = vld [vmem:[#allocation2 + $0x8] sm:$0xff] }
 0x2c8   : > { %1444 = vst [vmem:[%s2453_s7 + $0x60] sm:$0xff] %v1412_v52  ;;  %1445 = vst [vmem:[%s2453_s7 + $0x68] sm:$0xff] %v1413_v9  ;;  %v1415_v39 = vld [vmem:[#allocation2 + $0x78] sm:$0xff]  ;;  %v1418_v20 = vld [vmem:[#allocation2 + $0x40] sm:$0xff] }
 0x2c9   : > { %1446 = vst [vmem:[%s2453_s7 + $0x70] sm:$0xff] %v1414_v55  ;;  %v1416_v48 = vld [vmem:[#allocation2 + $0x38] sm:$0xff]  ;;  %1447 = vst [vmem:[%s2453_s7 + $0x78] sm:$0xff] %v1415_v39  ;;  %v1419_v60 = vld [vmem:[#allocation2 + $0xc8] sm:$0xff] }
 0x2ca   : > { %v1417_v2 = vld [vmem:[#allocation2 + $0x58] sm:$0xff]  ;;  %1448 = vst [vmem:[%s2453_s7 + $0x80] sm:$0xff] %v1416_v48  ;;  %v1420_v18 = vld [vmem:[#allocation2 + $0xe0] sm:$0xff]  ;;  %1450 = vst [vmem:[%s2453_s7 + $0x90] sm:$0xff] %v1418_v20 }
 0x2cb   : > { %1449 = vst [vmem:[%s2453_s7 + $0x88] sm:$0xff] %v1417_v2  ;;  %1451 = vst [vmem:[%s2453_s7 + $0x98] sm:$0xff] %v1419_v60  ;;  %v1421_v7 = vld [vmem:[#allocation2 + $0x90] sm:$0xff]  ;;  %v1423_v26 = vld [vmem:[#allocation2 + $0xc0] sm:$0xff] }
 0x2cc   : > { %1452 = vst [vmem:[%s2453_s7 + $0xa0] sm:$0xff] %v1420_v18  ;;  %v1422_v25 = vld [vmem:[#allocation2 + $0x70] sm:$0xff]  ;;  %1453 = vst [vmem:[%s2453_s7 + $0xa8] sm:$0xff] %v1421_v7  ;;  %v1424_v57 = vld [vmem:[#allocation2 + $0xa8] sm:$0xff] }
 0x2cd   : > { %1454 = vst [vmem:[%s2453_s7 + $0xb0] sm:$0xff] %v1422_v25  ;;  %1455 = vst [vmem:[%s2453_s7 + $0xb8] sm:$0xff] %v1423_v26  ;;  %v1425_v16 = vld [vmem:[#allocation2 + $0xd0] sm:$0xff]  ;;  %v1427_v27 = vld [vmem:[#allocation2 + $0x28] sm:$0xff] }
 0x2ce   : > { %v1426_v58 = vld [vmem:[#allocation2 + $0x10] sm:$0xff]  ;;  %1456 = vst [vmem:[%s2453_s7 + $0xc0] sm:$0xff] %v1424_v57  ;;  %1457 = vst [vmem:[%s2453_s7 + $0xc8] sm:$0xff] %v1425_v16  ;;  %v1428_v23 = vld [vmem:[#allocation2 + $0xa0] sm:$0xff] }
 0x2cf   : > { %1458 = vst [vmem:[%s2453_s7 + $0xd0] sm:$0xff] %v1426_v58  ;;  %v1429_v30 = vld [vmem:[#allocation2 + $0xf8] sm:$0xff]  ;;  %1459 = vst [vmem:[%s2453_s7 + $0xd8] sm:$0xff] %v1427_v27  ;;  %v1430_v53 = vld [vmem:[#allocation2 + $0x20] sm:$0xff] }
 0x2d0   : > { %1460 = vst [vmem:[%s2453_s7 + $0xe0] sm:$0xff] %v1428_v23  ;;  %1461 = vst [vmem:[%s2453_s7 + $0xe8] sm:$0xff] %v1429_v30  ;;  %v1431_v32 = vld [vmem:[#allocation2 + $0x98] sm:$0xff] }
 0x2d1   : > { %1462 = vst [vmem:[%s2453_s7 + $0xf0] sm:$0xff] %v1430_v53  ;;  %1463 = vst [vmem:[%s2453_s7 + $0xf8] sm:$0xff] %v1431_v32 }
 0x2d2 PF: > { %s1465_s18 = scalar_lea.sflag [#allocation5], %s2433_s1  ;;  %p3027_p13 = scmp.ne.s32.totalorder %s3021_s10, 0 }
 0x2d3   : > { %s1673_s23 = sshll.u32 (%p3027_p13), %s2183_s19, 4 }
 0x2d4   : > { %1471 = sbr.rel (!%p3027_p13) target bundleno = 757 (0x2f5), region = 56  ;;  %s1473_s4 = ssub.s32 (%p3027_p13), 18, %s1673_s23 }
 0x2d5   : > { %p1474_p8 = scmp.lt.s32.totalorder (%p3027_p13), %s1473_s4, 16 }
 0x2d9   : > { %s3054_s4 = smov (!%p1474_p8, %s1473_s4), 16 }
 0x2da   : > { %s2918_s9 = sshll.u32 %s3054_s4, 8 }
 0x2db   : > { %s1479_s28 = ssub.s32 4096, %s2918_s9 }
 0x2dc   : > { %1480 = vsyncadd %s1465_s18, %s1479_s28  ;;  %p1676_p2 = scmp.ne.s32.totalorder %s2918_s9, 0  ;;  %s1691_s10 = sshll.u32 %s2183_s19, 12 }
 0x2dd   : > { %s3028_s24 = sld [smem:[#allocation23_spill]]  ;;  %s1486_s0 = sshll.u32 %s2453_s7, 4  ;;  %s2931_s0 = int_to_ptr.vmem [resolvable:$true] %s1486_s0 }
 0x2de   : > { %s2071_s11 = scalar_lea.vmem %s2931_s0, %s2918_s9  ;;  %s2208_s3 = smov [#allocation9]  }
 0x2df   : > { %p2072_p1 = scmp.ne.s32.totalorder %s2931_s0, %s2071_s11  ;;  %s2075_s5 = sshll.u32 %s2208_s3, 4  ;;  %s2076_s5 = int_to_ptr.vmem [resolvable:$false] %s2075_s5 }
 0x2e0   : > { %s2077_s19 = scalar_lea.vmem %s2076_s5, 8192  ;;  %p2078_p4 = scmp.lt.s32.totalorder %s2931_s0, %s2076_s5 }
 0x2e1   : > { %p2073_p6 = pnand %p2072_p1, %p1676_p2  ;;  %p2079_p10 = scmp.lt.s32.totalorder %s2077_s19, %s2071_s11 }
 0x2e3   : > { %s2928_s29 = scalar_lea.hbm %s3028_s24, %s1691_s10  ;;  %p2074_p9 = pneg %p2073_p6 }
 0x2e4   : > { %p2080_p3 = por %p2079_p10, %p2078_p4 }
 0x2e6   : > { %p2081_p11 = pnand %p2080_p3, %p2074_p9 }
 0x2e8   : > { %2084 = shalt.err (!%p2081_p11)
}
 0x2e9   : > { %s2085_s6 = scalar_lea.hbm %s2928_s29, %s2918_s9  ;;  %s2089_s21 = scalar_lea.hbm %s3028_s24, 4608 }
 0x2ea   : > { %p2086_p0 = scmp.ne.s32.totalorder %s2928_s29, %s2085_s6  ;;  %p2090_p12 = scmp.lt.s32.totalorder %s2928_s29, %s3028_s24 }
 0x2eb   : > { %p2091_p13 = scmp.lt.s32.totalorder %s2089_s21, %s2085_s6 }
 0x2ec   : > { %p2087_p5 = pnand %p2086_p0, %p1676_p2 }
 0x2ed   : > { %p2092_p8 = por %p2091_p13, %p2090_p12 }
 0x2ee   : > { %p2088_p7 = pneg %p2087_p5 }
 0x2f0   : > { %p2093_p1 = pnand %p2092_p8, %p2088_p7 }
 0x2f2   : > { %2096 = shalt.err (!%p2093_p1)
}
 0x2f3   : > { %s2209_s17 = smov 256   ;;  %s2210_s25 = smov 16  }
 0x2f4   : > { %1492 = dma.vmem_to_hbm [thread:$0]  (%p1676_p2), %s2931_s0, %s2918_s9, %s2928_s29, %s1465_s18, %s2209_s17, %s2209_s17, %s2210_s25  }
 0x2f5 PF: > { %s3029_s7 = sld [smem:[#allocation13_spill]]  ;;  %p1766_p6 = scmp.ge.s32.totalorder %s2195_s22, 2 }
 0x2f6   : > { %s3030_s23 = sld [smem:[#allocation20_spill]] }
 0x2fb   : > { %s1501_s4 = sand.u32 1, %s3029_s7  }
 0x2fc   : > { %p3031_p9 = scmp.ne.s32.totalorder %s3030_s23, 0  ;;  %s1502_s28 = scalar_lea.sflag [#allocation5], %s1501_s4 }
 0x2fe   : > { %p1763_p4 = pnand %p1766_p6, %p3031_p9 }
 0x300   : > { %p1764_p10 = pneg %p1763_p4 }
 0x302   : > { %2150 = dma.done.wait (%p1764_p10), %s1502_s28, 4096  }
 0x303   : > { %2152 = vsyncadd (%p1764_p10), %s1502_s28, 4294963200  ;;  %s22_s22 = sadd.s32 1, %s2195_s22   ;;  %s3032_s1 = sld [smem:[#allocation18_spill]] }
 0x304   : > { %p19_p3 = scmp.ge.s32.totalorder %s22_s22, 6   ;;  %s3033_s18 = sld [smem:[#allocation14_spill]] }
 0x305   : > { %s3034_s17 = sld [smem:[#allocation19_spill]]  ;;  %s3038_s12 = smov %s2159_s13 }
 0x306   : > { %s3035_s19 = sld [smem:[#allocation15_spill]]  ;;  %s3039_s13 = smov %s2163_s14 }
 0x307   : > { %s3036_s9 = sld [smem:[#allocation16_spill]]  ;;  %s3041_s15 = smov %s2171_s16 }
 0x308   : > { %s3037_s21 = sld [smem:[#allocation17_spill]] }
 0x309   : > { %s3040_s14 = smov %s3032_s1  ;;  %21 = sbr.rel (!%p19_p3) target bundleno = 15 (0xf), region = 109 }
 0x30a   : > { %s3042_s16 = smov %s3033_s18  ;;  %s3043_s18 = smov %s2187_s20 }
 0x30d   : > { %s3044_s20 = smov %s3036_s9 }
 0x30e   :  { %1507 = vsyncpa [#allocation4], 1 }
 0x30f   :  { %1509 = vsyncpa [#allocation4 + $0x1], 1 }
 0x310   :  { %1510 = vsyncpa [#allocation7], 1 }
 0x311   :  { %1512 = vsyncpa [#allocation7 + $0x1], 1 }
 0x312   :  { %1513 = vsyncpa [#allocation5], 1 }
 0x313   :  { %1515 = vsyncpa [#allocation5 + $0x1], 1 }

</bundles_post_ra>
